<compile_context>
chip_gen: v7x
topology: tpu7x:2x2x1
jax: 0.10.0
libtpu: 0.0.40
codegen_flags: <defaults>
</compile_context>

<pallas_src>
import jax
import jax.numpy as jnp
from jax import lax
from jax.experimental import pallas as pl
from jax.experimental.pallas import tpu as pltpu

# ----- static problem constants implied by MyCNN and x.view(-1, 25) -----
CIN, C1, K1 = 10, 4, 10          # conv1: Conv1d(10 -> 4, k=10)
K2 = 5                           # conv2: Conv1d(4 -> 1, k=5)
H = 16                           # LSTM hidden size
L = 120                          # input length (gives exactly 25 pooled feats)
L1 = L - K1 + 1                  # 111
P1 = (L1 - 3) // 2 + 1           # 55
L2 = P1 - K2 + 1                 # 51
P2 = (L2 - 3) // 2 + 1           # 25 == MAGICNUM


# --------------------------- kernel 1: conv + pool (grid over batch) ---------------------------
def conv_pool_kernel(x_ref, w1_ref, b1_ref, w2_ref, b2_ref, out_ref, s1_ref, s2_ref):
    f32 = jnp.float32
    x_e = x_ref[0]                                              # (L, Cin): length on sublanes

    # conv1: in-kernel im2col (K1 shifted sublane slabs), shared (K1*Cin, C1) weight.
    cols1 = jnp.concatenate([x_e[k:k + L1, :] for k in range(K1)], axis=1)   # (L1, K1*Cin)
    s1_ref[...] = jnp.tanh(jnp.dot(cols1, w1_ref[...], preferred_element_type=f32)
                           + b1_ref[...])                       # (L1, C1)

    # MaxPool1d(3, 2): three strided sublane reads + max.
    p1 = jnp.maximum(
        jnp.maximum(s1_ref[pl.ds(0, P1, stride=2), :],
                    s1_ref[pl.ds(1, P1, stride=2), :]),
        s1_ref[pl.ds(2, P1, stride=2), :])                      # (P1, C1)

    # conv2: same shared-weight im2col trick.
    cols2 = jnp.concatenate([p1[k:k + L2, :] for k in range(K2)], axis=1)    # (L2, K2*C1)
    s2_ref[...] = jnp.tanh(jnp.dot(cols2, w2_ref[...], preferred_element_type=f32)
                           + b2_ref[...])                       # (L2, 1)

    p2 = jnp.maximum(
        jnp.maximum(s2_ref[pl.ds(0, P2, stride=2), :],
                    s2_ref[pl.ds(1, P2, stride=2), :]),
        s2_ref[pl.ds(2, P2, stride=2), :])                      # (P2, 1)
    out_ref[0] = p2                                             # row n of the (N, P2, 1) output


# ------------------------- kernel 2: LSTM (2 layers) + out head -------------------------
def lstm_head_kernel(x_ref, wih0t_ref, whh0t_ref, b0_ref,
                     w1cat_ref, bl1_ref, woutt_ref, bout_ref, age_ref,
                     out_ref, gx0_ref, hs_ref):
    f32 = jnp.float32
    N = x_ref.shape[0]            # timesteps == batch (unbatched LSTM sequence)

    def cell(gpre, c):
        # PyTorch gate order [i, f, g, o]; sigmoid via tanh identity (single EUP push).
        sg = 0.5 * (jnp.tanh(0.5 * gpre) + 1.0)
        tg = jnp.tanh(gpre)
        c_new = sg[:, H:2 * H] * c + sg[:, 0:H] * tg[:, 2 * H:3 * H]
        h_new = sg[:, 3 * H:4 * H] * jnp.tanh(c_new)
        return h_new, c_new

    # Layer-0 input preactivations (incl. combined bias) for ALL timesteps at once.
    gx0_ref[...] = (jnp.dot(x_ref[...], wih0t_ref[...], preferred_element_type=f32)
                    + b0_ref[...])                              # (N, 4H)

    whh0t = whh0t_ref[...]        # (H, 4H)
    w1cat = w1cat_ref[...]        # (2H, 4H): [wih1^T ; whh1^T]
    bl1 = bl1_ref[...]            # (1, 4H)

    # Prologue: layer-0 step 0 (h0(-1) == 0 so the recurrent term vanishes).
    h0, c0 = cell(gx0_ref[pl.ds(0, 1), :], jnp.zeros((1, H), f32))
    h1 = jnp.zeros((1, H), f32)
    c1 = jnp.zeros((1, H), f32)

    # Software-pipelined: iteration t runs layer-0 step t AND layer-1 step t-1
    # (both depend only on carried-in state -> the two chains can overlap).
    def body(t, carry):
        h0, c0, h1, c1 = carry
        g1 = (jnp.dot(jnp.concatenate([h0, h1], axis=1), w1cat,
                      preferred_element_type=f32) + bl1)
        h1n, c1n = cell(g1, c1)
        hs_ref[pl.ds(t - 1, 1), :] = h1n
        g0 = gx0_ref[pl.ds(t, 1), :] + jnp.dot(h0, whh0t, preferred_element_type=f32)
        h0n, c0n = cell(g0, c0)
        return (h0n, c0n, h1n, c1n)

    unroll = True if N <= 32 else 8
    h0, c0, h1, c1 = lax.fori_loop(1, N, body, (h0, c0, h1, c1), unroll=unroll)

    # Epilogue: layer-1 step N-1.
    g1 = (jnp.dot(jnp.concatenate([h0, h1], axis=1), w1cat,
                  preferred_element_type=f32) + bl1)
    h1f, _ = cell(g1, c1)
    hs_ref[pl.ds(N - 1, 1), :] = h1f

    # Final Linear(16 -> 1) over all timesteps + age scaling.
    y = jnp.dot(hs_ref[...], woutt_ref[...], preferred_element_type=f32) + bout_ref[...]
    age_scale = jnp.maximum(age_ref[...] * 1e-8 + 1.0, 0.0)     # relu(age*1e-8 + 1)
    out_ref[...] = y * age_scale                                # (N, 1)


# --------------------------------- wrappers -----------------------------------
def prepare_params(params):
    """One-time, x-independent weight preprocessing (hoisted out of the forward jit)."""
    p = {k: jnp.asarray(v, jnp.float32) for k, v in params.items()}
    w1r = jnp.transpose(p['W1'], (2, 1, 0)).reshape(K1 * CIN, C1)    # [k*Cin+c, o] = W1[o,c,k]
    b1row = p['b1'].reshape(1, C1)
    w2r = jnp.transpose(p['W2'][0], (1, 0)).reshape(K2 * C1, 1)      # [k*C1+c, 0] = W2[0,c,k]
    b2row = p['b2'].reshape(1, 1)
    wih0t = p['wih0'].T                                              # (25, 4H)
    whh0t = p['whh0'].T                                              # (H, 4H)
    b0row = (p['bih0'] + p['bhh0']).reshape(1, 4 * H)
    w1cat = jnp.concatenate([p['wih1'].T, p['whh1'].T], axis=0)      # (2H, 4H)
    bl1row = (p['bih1'] + p['bhh1']).reshape(1, 4 * H)
    woutt = p['Wout'].T                                              # (H, 1)
    bout = p['bout'].reshape(1, 1)
    return dict(w1r=w1r, b1row=b1row, w2r=w2r, b2row=b2row, wih0t=wih0t,
                whh0t=whh0t, b0row=b0row, w1cat=w1cat, bl1row=bl1row,
                woutt=woutt, bout=bout)


def mycnn_forward(x, age, prep):
    """x: (N, 10, 120) in PyTorch NCL layout, age: (N,). Returns (N,) float32."""
    N = x.shape[0]
    assert x.shape[1] == CIN and x.shape[2] == L
    x_lnc = jnp.transpose(x.astype(jnp.float32), (0, 2, 1))          # (N, L, Cin)

    conv_out = pl.pallas_call(
        conv_pool_kernel,
        out_shape=jax.ShapeDtypeStruct((N, P2, 1), jnp.float32),
        grid_spec=pltpu.PrefetchScalarGridSpec(
            num_scalar_prefetch=0,
            grid=(N,),
            in_specs=[
                pl.BlockSpec((1, L, CIN), lambda n: (n, 0, 0)),
                pl.BlockSpec((K1 * CIN, C1), lambda n: (0, 0)),
                pl.BlockSpec((1, C1), lambda n: (0, 0)),
                pl.BlockSpec((K2 * C1, 1), lambda n: (0, 0)),
                pl.BlockSpec((1, 1), lambda n: (0, 0)),
            ],
            out_specs=pl.BlockSpec((1, P2, 1), lambda n: (n, 0, 0)),
            scratch_shapes=[pltpu.VMEM((L1, C1), jnp.float32),
                            pltpu.VMEM((L2, 1), jnp.float32)],
        ),
        compiler_params=pltpu.CompilerParams(
            dimension_semantics=("parallel",),
            vmem_limit_bytes=32 * 1024 * 1024),
    )(x_lnc, prep['w1r'], prep['b1row'], prep['w2r'], prep['b2row'])

    xrows = conv_out.reshape(N, P2)              # == x.view(-1, 25)  (layout plumbing only)
    age_col = age.reshape(N, 1).astype(jnp.float32)

    out = pl.pallas_call(
        lstm_head_kernel,
        out_shape=jax.ShapeDtypeStruct((N, 1), jnp.float32),
        in_specs=[pl.BlockSpec(memory_space=pltpu.MemorySpace.VMEM)] * 9,
        out_specs=pl.BlockSpec(memory_space=pltpu.MemorySpace.VMEM),
        scratch_shapes=[pltpu.VMEM((N, 4 * H), jnp.float32),
                        pltpu.VMEM((N, H), jnp.float32)],
        compiler_params=pltpu.CompilerParams(vmem_limit_bytes=32 * 1024 * 1024),
    )(xrows, prep['wih0t'], prep['whh0t'], prep['b0row'],
      prep['w1cat'], prep['bl1row'], prep['woutt'], prep['bout'], age_col)
    return out[:, 0]


# ---------------- plain-JAX reference (mirrors PyTorch semantics) ----------------
def ref_forward(x, age, p):
    hp = jax.lax.Precision.HIGHEST

    def conv1d(h, W, b):
        Cout, Cin, K = W.shape
        Lo = h.shape[-1] - K + 1
        cols = jnp.stack([h[:, :, k:k + Lo] for k in range(K)], axis=1)   # (N,K,Cin,Lo)
        return jnp.einsum('nkcl,ock->nol', cols, W, precision=hp) + b[None, :, None]

    def maxpool(h):
        Lc = h.shape[-1]
        P = (Lc - 3) // 2 + 1
        w = jnp.stack([h[..., j:j + 2 * P:2] for j in range(3)], axis=-1)
        return jnp.max(w, axis=-1)

    def lstm_layer(xs, wih, whh, bih, bhh):
        T = xs.shape[0]
        Hh = whh.shape[1]
        h = jnp.zeros((Hh,), jnp.float32)
        c = jnp.zeros((Hh,), jnp.float32)
        outs = []
        for t in range(T):
            g = (jnp.dot(wih, xs[t], precision=hp) + bih
                 + jnp.dot(whh, h, precision=hp) + bhh)
            i = jax.nn.sigmoid(g[0:Hh]);      f = jax.nn.sigmoid(g[Hh:2 * Hh])
            gg = jnp.tanh(g[2 * Hh:3 * Hh]);  o = jax.nn.sigmoid(g[3 * Hh:4 * Hh])
            c = f * c + i * gg
            h = o * jnp.tanh(c)
            outs.append(h)
        return jnp.stack(outs)

    h = jnp.tanh(conv1d(x, p['W1'], p['b1']))
    h = maxpool(h)
    h = jnp.tanh(conv1d(h, p['W2'], p['b2']))
    h = maxpool(h)
    flat = h.reshape(-1, 25)
    o1 = lstm_layer(flat, p['wih0'], p['whh0'], p['bih0'], p['bhh0'])
    o2 = lstm_layer(o1, p['wih1'], p['whh1'], p['bih1'], p['bhh1'])
    y = jnp.dot(o2, p['Wout'].T, precision=hp) + p['bout']                # (T, 1)
    age_scale = jax.nn.relu(age[:, None] * 1e-8 + 1.0)
    return (y * age_scale)[:, 0]


if __name__ == "__main__":
    key = jax.random.PRNGKey(0)
    ks = jax.random.split(key, 16)

    def u(k, shape, s=0.2):
        return jax.random.uniform(k, shape, jnp.float32, -s, s)

    # Deterministic synthetic parameters (shapes from MyCNN.__init__).
    params = {
        'W1':   u(ks[0], (4, 10, 10)),   'b1':   u(ks[1], (4,)),
        'W2':   u(ks[2], (1, 4, 5)),     'b2':   u(ks[3], (1,)),
        'wih0': u(ks[4], (64, 25)),      'whh0': u(ks[5], (64, 16)),
        'bih0': u(ks[6], (64,)),         'bhh0': u(ks[7], (64,)),
        'wih1': u(ks[8], (64, 16)),      'whh1': u(ks[9], (64, 16)),
        'bih1': u(ks[10], (64,)),        'bhh1': u(ks[11], (64,)),
        'Wout': u(ks[12], (1, 16)),      'bout': u(ks[13], (1,)),
    }

    # Smallest batch/length consistent with x.view(-1, 25): L=120 gives 25 pooled feats.
    N = 4
    x = jax.random.normal(ks[14], (N, 10, L), jnp.float32)
    age = jax.random.uniform(ks[15], (N,), jnp.float32, 20.0, 80.0)

    prep = prepare_params(params)            # one-time weight prep, outside the jit
    fwd = jax.jit(mycnn_forward)
    y = fwd(x, age, prep)
    y = jax.block_until_ready(y)
    assert y.shape == (N,)

    y_ref = ref_forward(x, age, {k: jnp.asarray(v, jnp.float32) for k, v in params.items()})
    if not bool(jnp.allclose(y, y_ref, atol=1e-2, rtol=1e-2)):
        raise SystemExit(f"MISMATCH: kernel={y} ref={y_ref}")

    print("KERNEL_OK")
</pallas_src>

<mosaic_0001>
module attributes {stable_mosaic.version = 11 : i64} {
  func.func @conv_pool_kernel(%arg0: i32, %arg1: memref<1x120x10xf32, #tpu.memory_space<vmem>>, %arg2: memref<100x4xf32, #tpu.memory_space<vmem>>, %arg3: memref<1x4xf32, #tpu.memory_space<vmem>>, %arg4: memref<20x1xf32, #tpu.memory_space<vmem>>, %arg5: memref<1x1xf32, #tpu.memory_space<vmem>>, %arg6: memref<1x25x1xf32, #tpu.memory_space<vmem>>, %arg7: memref<111x4xf32, #tpu.memory_space<vmem>>, %arg8: memref<51x1xf32, #tpu.memory_space<vmem>>) attributes {dimension_semantics = [#tpu.dimension_semantics<parallel>], iteration_bounds = array<i64: 4>, scalar_prefetch = 0 : i64, scratch_operands = 2 : i64, tpu.core_type = #tpu.core_type<tc>, window_params = [{transform_indices = @transform_0, window_bounds = array<i64: 1, 120, 10>}, {pipeline_mode = #tpu.pipeline_mode<synchronous>, transform_indices = @transform_1, window_bounds = array<i64: 100, 4>}, {pipeline_mode = #tpu.pipeline_mode<synchronous>, transform_indices = @transform_2, window_bounds = array<i64: 1, 4>}, {pipeline_mode = #tpu.pipeline_mode<synchronous>, transform_indices = @transform_3, window_bounds = array<i64: 20, 1>}, {pipeline_mode = #tpu.pipeline_mode<synchronous>, transform_indices = @transform_4, window_bounds = array<i64: 1, 1>}, {transform_indices = @transform_5, window_bounds = array<i64: 1, 25, 1>}]} {
    %c0 = arith.constant 0 : index
    %c0_0 = arith.constant 0 : index
    %c0_1 = arith.constant 0 : index
    %0 = vector.load %arg1[%c0, %c0_0, %c0_1] : memref<1x120x10xf32, #tpu.memory_space<vmem>>, vector<1x120x10xf32>
    %1 = vector.shape_cast %0 : vector<1x120x10xf32> to vector<120x10xf32>
    %2 = vector.extract_strided_slice %1 {offsets = [0, 0], sizes = [111, 10], strides = [1, 1]} : vector<120x10xf32> to vector<111x10xf32>
    %3 = vector.extract_strided_slice %1 {offsets = [1, 0], sizes = [111, 10], strides = [1, 1]} : vector<120x10xf32> to vector<111x10xf32>
    %4 = vector.extract_strided_slice %1 {offsets = [2, 0], sizes = [111, 10], strides = [1, 1]} : vector<120x10xf32> to vector<111x10xf32>
    %5 = vector.extract_strided_slice %1 {offsets = [3, 0], sizes = [111, 10], strides = [1, 1]} : vector<120x10xf32> to vector<111x10xf32>
    %6 = vector.extract_strided_slice %1 {offsets = [4, 0], sizes = [111, 10], strides = [1, 1]} : vector<120x10xf32> to vector<111x10xf32>
    %7 = vector.extract_strided_slice %1 {offsets = [5, 0], sizes = [111, 10], strides = [1, 1]} : vector<120x10xf32> to vector<111x10xf32>
    %8 = vector.extract_strided_slice %1 {offsets = [6, 0], sizes = [111, 10], strides = [1, 1]} : vector<120x10xf32> to vector<111x10xf32>
    %9 = vector.extract_strided_slice %1 {offsets = [7, 0], sizes = [111, 10], strides = [1, 1]} : vector<120x10xf32> to vector<111x10xf32>
    %10 = vector.extract_strided_slice %1 {offsets = [8, 0], sizes = [111, 10], strides = [1, 1]} : vector<120x10xf32> to vector<111x10xf32>
    %11 = vector.extract_strided_slice %1 {offsets = [9, 0], sizes = [111, 10], strides = [1, 1]} : vector<120x10xf32> to vector<111x10xf32>
    %12 = tpu.concatenate %2, %3, %4, %5, %6, %7, %8, %9, %10, %11 in 1 : vector<111x10xf32>, vector<111x10xf32>, vector<111x10xf32>, vector<111x10xf32>, vector<111x10xf32>, vector<111x10xf32>, vector<111x10xf32>, vector<111x10xf32>, vector<111x10xf32>, vector<111x10xf32> -> vector<111x100xf32>
    %c0_2 = arith.constant 0 : index
    %c0_3 = arith.constant 0 : index
    %13 = vector.load %arg2[%c0_2, %c0_3] : memref<100x4xf32, #tpu.memory_space<vmem>>, vector<100x4xf32>
    %cst = arith.constant dense<0.000000e+00> : vector<111x4xf32>
    %14 = tpu.matmul %12, %13, %cst {dimension_numbers = #tpu.dot_dimension_numbers<[1], [0], [0], [1], [0, 0, 1, 1], [], []>} : vector<111x100xf32>, vector<100x4xf32>, vector<111x4xf32> -> vector<111x4xf32>
    %c0_4 = arith.constant 0 : index
    %c0_5 = arith.constant 0 : index
    %15 = vector.load %arg3[%c0_4, %c0_5] : memref<1x4xf32, #tpu.memory_space<vmem>>, vector<1x4xf32>
    %16 = vector.broadcast %15 : vector<1x4xf32> to vector<111x4xf32>
    %17 = arith.addf %14, %16 : vector<111x4xf32>
    %18 = math.tanh %17 : vector<111x4xf32>
    %c0_6 = arith.constant 0 : index
    %c0_7 = arith.constant 0 : index
    %19 = vector.load %arg7[%c0_6, %c0_7] : memref<111x4xf32, #tpu.memory_space<vmem>>, vector<111x4xf32>
    tpu.vector_store %arg7[%c0_6, %c0_7], %18 {strides = array<i32>} : memref<111x4xf32, #tpu.memory_space<vmem>>, vector<111x4xf32>,
    %c0_8 = arith.constant 0 : index
    %c0_9 = arith.constant 0 : index
    %20 = tpu.strided_load %arg7[%c0_8, %c0_9] {strides = array<i32: 2, 1>} : memref<111x4xf32, #tpu.memory_space<vmem>>, vector<55x4xf32>
    %c1 = arith.constant 1 : index
    %c0_10 = arith.constant 0 : index
    %21 = tpu.strided_load %arg7[%c1, %c0_10] {strides = array<i32: 2, 1>} : memref<111x4xf32, #tpu.memory_space<vmem>>, vector<55x4xf32>
    %22 = arith.maximumf %20, %21 : vector<55x4xf32>
    %c2 = arith.constant 2 : index
    %c0_11 = arith.constant 0 : index
    %23 = tpu.strided_load %arg7[%c2, %c0_11] {strides = array<i32: 2, 1>} : memref<111x4xf32, #tpu.memory_space<vmem>>, vector<55x4xf32>
    %24 = arith.maximumf %22, %23 : vector<55x4xf32>
    %25 = vector.extract_strided_slice %24 {offsets = [0, 0], sizes = [51, 4], strides = [1, 1]} : vector<55x4xf32> to vector<51x4xf32>
    %26 = vector.extract_strided_slice %24 {offsets = [1, 0], sizes = [51, 4], strides = [1, 1]} : vector<55x4xf32> to vector<51x4xf32>
    %27 = vector.extract_strided_slice %24 {offsets = [2, 0], sizes = [51, 4], strides = [1, 1]} : vector<55x4xf32> to vector<51x4xf32>
    %28 = vector.extract_strided_slice %24 {offsets = [3, 0], sizes = [51, 4], strides = [1, 1]} : vector<55x4xf32> to vector<51x4xf32>
    %29 = vector.extract_strided_slice %24 {offsets = [4, 0], sizes = [51, 4], strides = [1, 1]} : vector<55x4xf32> to vector<51x4xf32>
    %30 = tpu.concatenate %25, %26, %27, %28, %29 in 1 : vector<51x4xf32>, vector<51x4xf32>, vector<51x4xf32>, vector<51x4xf32>, vector<51x4xf32> -> vector<51x20xf32>
    %c0_12 = arith.constant 0 : index
    %c0_13 = arith.constant 0 : index
    %31 = vector.load %arg4[%c0_12, %c0_13] : memref<20x1xf32, #tpu.memory_space<vmem>>, vector<20x1xf32>
    %cst_14 = arith.constant dense<0.000000e+00> : vector<51x1xf32>
    %32 = tpu.matmul %30, %31, %cst_14 {dimension_numbers = #tpu.dot_dimension_numbers<[1], [0], [0], [1], [0, 0, 1, 1], [], []>} : vector<51x20xf32>, vector<20x1xf32>, vector<51x1xf32> -> vector<51x1xf32>
    %c0_15 = arith.constant 0 : index
    %c0_16 = arith.constant 0 : index
    %33 = vector.load %arg5[%c0_15, %c0_16] : memref<1x1xf32, #tpu.memory_space<vmem>>, vector<1x1xf32>
    %34 = vector.broadcast %33 : vector<1x1xf32> to vector<51x1xf32>
    %35 = arith.addf %32, %34 : vector<51x1xf32>
    %36 = math.tanh %35 : vector<51x1xf32>
    %c0_17 = arith.constant 0 : index
    %c0_18 = arith.constant 0 : index
    %37 = vector.load %arg8[%c0_17, %c0_18] : memref<51x1xf32, #tpu.memory_space<vmem>>, vector<51x1xf32>
    tpu.vector_store %arg8[%c0_17, %c0_18], %36 {strides = array<i32>} : memref<51x1xf32, #tpu.memory_space<vmem>>, vector<51x1xf32>,
    %c0_19 = arith.constant 0 : index
    %c0_20 = arith.constant 0 : index
    %38 = tpu.strided_load %arg8[%c0_19, %c0_20] {strides = array<i32: 2, 1>} : memref<51x1xf32, #tpu.memory_space<vmem>>, vector<25x1xf32>
    %c1_21 = arith.constant 1 : index
    %c0_22 = arith.constant 0 : index
    %39 = tpu.strided_load %arg8[%c1_21, %c0_22] {strides = array<i32: 2, 1>} : memref<51x1xf32, #tpu.memory_space<vmem>>, vector<25x1xf32>
    %40 = arith.maximumf %38, %39 : vector<25x1xf32>
    %c2_23 = arith.constant 2 : index
    %c0_24 = arith.constant 0 : index
    %41 = tpu.strided_load %arg8[%c2_23, %c0_24] {strides = array<i32: 2, 1>} : memref<51x1xf32, #tpu.memory_space<vmem>>, vector<25x1xf32>
    %42 = arith.maximumf %40, %41 : vector<25x1xf32>
    %c0_25 = arith.constant 0 : index
    %c0_26 = arith.constant 0 : index
    %c0_27 = arith.constant 0 : index
    %43 = vector.load %arg6[%c0_25, %c0_26, %c0_27] : memref<1x25x1xf32, #tpu.memory_space<vmem>>, vector<1x25x1xf32>
    %44 = vector.shape_cast %43 : vector<1x25x1xf32> to vector<25x1xf32>
    %45 = vector.shape_cast %42 : vector<25x1xf32> to vector<1x25x1xf32>
    tpu.vector_store %arg6[%c0_25, %c0_26, %c0_27], %45 {strides = array<i32>} : memref<1x25x1xf32, #tpu.memory_space<vmem>>, vector<1x25x1xf32>,
    return
  }
  func.func @transform_0(%arg0: i32) -> (i32, i32, i32) {
    %c0_i32 = arith.constant 0 : i32
    %c0_i32_0 = arith.constant 0 : i32
    %c0_i32_1 = arith.constant 0 : i32
    return %arg0, %c0_i32, %c0_i32_0 : i32, i32, i32
  }
  func.func @transform_1(%arg0: i32) -> (i32, i32) {
    %c0_i32 = arith.constant 0 : i32
    %c0_i32_0 = arith.constant 0 : i32
    %c0_i32_1 = arith.constant 0 : i32
    return %c0_i32, %c0_i32_0 : i32, i32
  }
  func.func @transform_2(%arg0: i32) -> (i32, i32) {
    %c0_i32 = arith.constant 0 : i32
    %c0_i32_0 = arith.constant 0 : i32
    %c0_i32_1 = arith.constant 0 : i32
    return %c0_i32, %c0_i32_0 : i32, i32
  }
  func.func @transform_3(%arg0: i32) -> (i32, i32) {
    %c0_i32 = arith.constant 0 : i32
    %c0_i32_0 = arith.constant 0 : i32
    %c0_i32_1 = arith.constant 0 : i32
    return %c0_i32, %c0_i32_0 : i32, i32
  }
  func.func @transform_4(%arg0: i32) -> (i32, i32) {
    %c0_i32 = arith.constant 0 : i32
    %c0_i32_0 = arith.constant 0 : i32
    %c0_i32_1 = arith.constant 0 : i32
    return %c0_i32, %c0_i32_0 : i32, i32
  }
  func.func @transform_5(%arg0: i32) -> (i32, i32, i32) {
    %c0_i32 = arith.constant 0 : i32
    %c0_i32_0 = arith.constant 0 : i32
    %c0_i32_1 = arith.constant 0 : i32
    return %arg0, %c0_i32, %c0_i32_0 : i32, i32, i32
  }
}

module attributes {stable_mosaic.version = 11 : i64} {
  func.func @lstm_head_kernel(%arg0: memref<4x25xf32, #tpu.memory_space<vmem>>, %arg1: memref<25x64xf32, #tpu.memory_space<vmem>>, %arg2: memref<16x64xf32, #tpu.memory_space<vmem>>, %arg3: memref<1x64xf32, #tpu.memory_space<vmem>>, %arg4: memref<32x64xf32, #tpu.memory_space<vmem>>, %arg5: memref<1x64xf32, #tpu.memory_space<vmem>>, %arg6: memref<16x1xf32, #tpu.memory_space<vmem>>, %arg7: memref<1x1xf32, #tpu.memory_space<vmem>>, %arg8: memref<4x1xf32, #tpu.memory_space<vmem>>, %arg9: memref<4x1xf32, #tpu.memory_space<vmem>>, %arg10: memref<4x64xf32, #tpu.memory_space<vmem>>, %arg11: memref<4x16xf32, #tpu.memory_space<vmem>>) attributes {dimension_semantics = [], scalar_prefetch = 0 : i64, scratch_operands = 2 : i64, tpu.core_type = #tpu.core_type<tc>} {
    %c0 = arith.constant 0 : index
    %c0_0 = arith.constant 0 : index
    %0 = vector.load %arg0[%c0, %c0_0] : memref<4x25xf32, #tpu.memory_space<vmem>>, vector<4x25xf32>
    %c0_1 = arith.constant 0 : index
    %c0_2 = arith.constant 0 : index
    %1 = vector.load %arg1[%c0_1, %c0_2] : memref<25x64xf32, #tpu.memory_space<vmem>>, vector<25x64xf32>
    %cst = arith.constant dense<0.000000e+00> : vector<4x64xf32>
    %2 = tpu.matmul %0, %1, %cst {dimension_numbers = #tpu.dot_dimension_numbers<[1], [0], [0], [1], [0, 0, 1, 1], [], []>} : vector<4x25xf32>, vector<25x64xf32>, vector<4x64xf32> -> vector<4x64xf32>
    %c0_3 = arith.constant 0 : index
    %c0_4 = arith.constant 0 : index
    %3 = vector.load %arg3[%c0_3, %c0_4] : memref<1x64xf32, #tpu.memory_space<vmem>>, vector<1x64xf32>
    %4 = vector.broadcast %3 : vector<1x64xf32> to vector<4x64xf32>
    %5 = arith.addf %2, %4 : vector<4x64xf32>
    %c0_5 = arith.constant 0 : index
    %c0_6 = arith.constant 0 : index
    %6 = vector.load %arg10[%c0_5, %c0_6] : memref<4x64xf32, #tpu.memory_space<vmem>>, vector<4x64xf32>
    tpu.vector_store %arg10[%c0_5, %c0_6], %5 {strides = array<i32>} : memref<4x64xf32, #tpu.memory_space<vmem>>, vector<4x64xf32>,
    %c0_7 = arith.constant 0 : index
    %c0_8 = arith.constant 0 : index
    %7 = vector.load %arg2[%c0_7, %c0_8] : memref<16x64xf32, #tpu.memory_space<vmem>>, vector<16x64xf32>
    %c0_9 = arith.constant 0 : index
    %c0_10 = arith.constant 0 : index
    %8 = vector.load %arg4[%c0_9, %c0_10] : memref<32x64xf32, #tpu.memory_space<vmem>>, vector<32x64xf32>
    %c0_11 = arith.constant 0 : index
    %c0_12 = arith.constant 0 : index
    %9 = vector.load %arg5[%c0_11, %c0_12] : memref<1x64xf32, #tpu.memory_space<vmem>>, vector<1x64xf32>
    %c0_13 = arith.constant 0 : index
    %c0_14 = arith.constant 0 : index
    %10 = vector.load %arg10[%c0_13, %c0_14] : memref<4x64xf32, #tpu.memory_space<vmem>>, vector<1x64xf32>
    %cst_15 = arith.constant 0.000000e+00 : f32
    %11 = vector.broadcast %cst_15 : f32 to vector<1x16xf32>
    %cst_16 = arith.constant 5.000000e-01 : f32
    %12 = vector.broadcast %cst_16 : f32 to vector<1x64xf32>
    %13 = arith.mulf %12, %10 : vector<1x64xf32>
    %14 = math.tanh %13 : vector<1x64xf32>
    %cst_17 = arith.constant 1.000000e+00 : f32
    %15 = vector.broadcast %cst_17 : f32 to vector<1x64xf32>
    %16 = arith.addf %14, %15 : vector<1x64xf32>
    %cst_18 = arith.constant 5.000000e-01 : f32
    %17 = vector.broadcast %cst_18 : f32 to vector<1x64xf32>
    %18 = arith.mulf %17, %16 : vector<1x64xf32>
    %19 = math.tanh %10 : vector<1x64xf32>
    %20 = vector.extract_strided_slice %18 {offsets = [0, 16], sizes = [1, 16], strides = [1, 1]} : vector<1x64xf32> to vector<1x16xf32>
    %21 = arith.mulf %20, %11 : vector<1x16xf32>
    %22 = vector.extract_strided_slice %18 {offsets = [0, 0], sizes = [1, 16], strides = [1, 1]} : vector<1x64xf32> to vector<1x16xf32>
    %23 = vector.extract_strided_slice %19 {offsets = [0, 32], sizes = [1, 16], strides = [1, 1]} : vector<1x64xf32> to vector<1x16xf32>
    %24 = arith.mulf %22, %23 : vector<1x16xf32>
    %25 = arith.addf %21, %24 : vector<1x16xf32>
    %26 = vector.extract_strided_slice %18 {offsets = [0, 48], sizes = [1, 16], strides = [1, 1]} : vector<1x64xf32> to vector<1x16xf32>
    %27 = math.tanh %25 : vector<1x16xf32>
    %28 = arith.mulf %26, %27 : vector<1x16xf32>
    %cst_19 = arith.constant 0.000000e+00 : f32
    %29 = vector.broadcast %cst_19 : f32 to vector<1x16xf32>
    %cst_20 = arith.constant 0.000000e+00 : f32
    %30 = vector.broadcast %cst_20 : f32 to vector<1x16xf32>
    %c1_i32 = arith.constant 1 : i32
    %31 = tpu.concatenate %28, %29 in 1 : vector<1x16xf32>, vector<1x16xf32> -> vector<1x32xf32>
    %cst_21 = arith.constant dense<0.000000e+00> : vector<1x64xf32>
    %32 = tpu.matmul %31, %8, %cst_21 {dimension_numbers = #tpu.dot_dimension_numbers<[1], [0], [0], [1], [0, 0, 1, 1], [], []>} : vector<1x32xf32>, vector<32x64xf32>, vector<1x64xf32> -> vector<1x64xf32>
    %33 = arith.addf %32, %9 : vector<1x64xf32>
    %cst_22 = arith.constant 5.000000e-01 : f32
    %34 = vector.broadcast %cst_22 : f32 to vector<1x64xf32>
    %35 = arith.mulf %34, %33 : vector<1x64xf32>
    %36 = math.tanh %35 : vector<1x64xf32>
    %cst_23 = arith.constant 1.000000e+00 : f32
    %37 = vector.broadcast %cst_23 : f32 to vector<1x64xf32>
    %38 = arith.addf %36, %37 : vector<1x64xf32>
    %cst_24 = arith.constant 5.000000e-01 : f32
    %39 = vector.broadcast %cst_24 : f32 to vector<1x64xf32>
    %40 = arith.mulf %39, %38 : vector<1x64xf32>
    %41 = math.tanh %33 : vector<1x64xf32>
    %42 = vector.extract_strided_slice %40 {offsets = [0, 16], sizes = [1, 16], strides = [1, 1]} : vector<1x64xf32> to vector<1x16xf32>
    %43 = arith.mulf %42, %30 : vector<1x16xf32>
    %44 = vector.extract_strided_slice %40 {offsets = [0, 0], sizes = [1, 16], strides = [1, 1]} : vector<1x64xf32> to vector<1x16xf32>
    %45 = vector.extract_strided_slice %41 {offsets = [0, 32], sizes = [1, 16], strides = [1, 1]} : vector<1x64xf32> to vector<1x16xf32>
    %46 = arith.mulf %44, %45 : vector<1x16xf32>
    %47 = arith.addf %43, %46 : vector<1x16xf32>
    %48 = vector.extract_strided_slice %40 {offsets = [0, 48], sizes = [1, 16], strides = [1, 1]} : vector<1x64xf32> to vector<1x16xf32>
    %49 = math.tanh %47 : vector<1x16xf32>
    %50 = arith.mulf %48, %49 : vector<1x16xf32>
    %c1_i32_25 = arith.constant 1 : i32
    %51 = arith.subi %c1_i32, %c1_i32_25 : i32
    %52 = arith.index_cast %51 : i32 to index
    %c0_26 = arith.constant 0 : index
    %53 = vector.load %arg11[%52, %c0_26] : memref<4x16xf32, #tpu.memory_space<vmem>>, vector<1x16xf32>
    tpu.vector_store %arg11[%52, %c0_26], %50 {strides = array<i32>} : memref<4x16xf32, #tpu.memory_space<vmem>>, vector<1x16xf32>,
    %54 = arith.index_cast %c1_i32 : i32 to index
    %c0_27 = arith.constant 0 : index
    %55 = vector.load %arg10[%54, %c0_27] : memref<4x64xf32, #tpu.memory_space<vmem>>, vector<1x64xf32>
    %cst_28 = arith.constant dense<0.000000e+00> : vector<1x64xf32>
    %56 = tpu.matmul %28, %7, %cst_28 {dimension_numbers = #tpu.dot_dimension_numbers<[1], [0], [0], [1], [0, 0, 1, 1], [], []>} : vector<1x16xf32>, vector<16x64xf32>, vector<1x64xf32> -> vector<1x64xf32>
    %57 = arith.addf %55, %56 : vector<1x64xf32>
    %cst_29 = arith.constant 5.000000e-01 : f32
    %58 = vector.broadcast %cst_29 : f32 to vector<1x64xf32>
    %59 = arith.mulf %58, %57 : vector<1x64xf32>
    %60 = math.tanh %59 : vector<1x64xf32>
    %cst_30 = arith.constant 1.000000e+00 : f32
    %61 = vector.broadcast %cst_30 : f32 to vector<1x64xf32>
    %62 = arith.addf %60, %61 : vector<1x64xf32>
    %cst_31 = arith.constant 5.000000e-01 : f32
    %63 = vector.broadcast %cst_31 : f32 to vector<1x64xf32>
    %64 = arith.mulf %63, %62 : vector<1x64xf32>
    %65 = math.tanh %57 : vector<1x64xf32>
    %66 = vector.extract_strided_slice %64 {offsets = [0, 16], sizes = [1, 16], strides = [1, 1]} : vector<1x64xf32> to vector<1x16xf32>
    %67 = arith.mulf %66, %25 : vector<1x16xf32>
    %68 = vector.extract_strided_slice %64 {offsets = [0, 0], sizes = [1, 16], strides = [1, 1]} : vector<1x64xf32> to vector<1x16xf32>
    %69 = vector.extract_strided_slice %65 {offsets = [0, 32], sizes = [1, 16], strides = [1, 1]} : vector<1x64xf32> to vector<1x16xf32>
    %70 = arith.mulf %68, %69 : vector<1x16xf32>
    %71 = arith.addf %67, %70 : vector<1x16xf32>
    %72 = vector.extract_strided_slice %64 {offsets = [0, 48], sizes = [1, 16], strides = [1, 1]} : vector<1x64xf32> to vector<1x16xf32>
    %73 = math.tanh %71 : vector<1x16xf32>
    %74 = arith.mulf %72, %73 : vector<1x16xf32>
    %c2_i32 = arith.constant 2 : i32
    %75 = tpu.concatenate %74, %50 in 1 : vector<1x16xf32>, vector<1x16xf32> -> vector<1x32xf32>
    %cst_32 = arith.constant dense<0.000000e+00> : vector<1x64xf32>
    %76 = tpu.matmul %75, %8, %cst_32 {dimension_numbers = #tpu.dot_dimension_numbers<[1], [0], [0], [1], [0, 0, 1, 1], [], []>} : vector<1x32xf32>, vector<32x64xf32>, vector<1x64xf32> -> vector<1x64xf32>
    %77 = arith.addf %76, %9 : vector<1x64xf32>
    %cst_33 = arith.constant 5.000000e-01 : f32
    %78 = vector.broadcast %cst_33 : f32 to vector<1x64xf32>
    %79 = arith.mulf %78, %77 : vector<1x64xf32>
    %80 = math.tanh %79 : vector<1x64xf32>
    %cst_34 = arith.constant 1.000000e+00 : f32
    %81 = vector.broadcast %cst_34 : f32 to vector<1x64xf32>
    %82 = arith.addf %80, %81 : vector<1x64xf32>
    %cst_35 = arith.constant 5.000000e-01 : f32
    %83 = vector.broadcast %cst_35 : f32 to vector<1x64xf32>
    %84 = arith.mulf %83, %82 : vector<1x64xf32>
    %85 = math.tanh %77 : vector<1x64xf32>
    %86 = vector.extract_strided_slice %84 {offsets = [0, 16], sizes = [1, 16], strides = [1, 1]} : vector<1x64xf32> to vector<1x16xf32>
    %87 = arith.mulf %86, %47 : vector<1x16xf32>
    %88 = vector.extract_strided_slice %84 {offsets = [0, 0], sizes = [1, 16], strides = [1, 1]} : vector<1x64xf32> to vector<1x16xf32>
    %89 = vector.extract_strided_slice %85 {offsets = [0, 32], sizes = [1, 16], strides = [1, 1]} : vector<1x64xf32> to vector<1x16xf32>
    %90 = arith.mulf %88, %89 : vector<1x16xf32>
    %91 = arith.addf %87, %90 : vector<1x16xf32>
    %92 = vector.extract_strided_slice %84 {offsets = [0, 48], sizes = [1, 16], strides = [1, 1]} : vector<1x64xf32> to vector<1x16xf32>
    %93 = math.tanh %91 : vector<1x16xf32>
    %94 = arith.mulf %92, %93 : vector<1x16xf32>
    %c1_i32_36 = arith.constant 1 : i32
    %95 = arith.subi %c2_i32, %c1_i32_36 : i32
    %96 = arith.index_cast %95 : i32 to index
    %c0_37 = arith.constant 0 : index
    %97 = vector.load %arg11[%96, %c0_37] : memref<4x16xf32, #tpu.memory_space<vmem>>, vector<1x16xf32>
    tpu.vector_store %arg11[%96, %c0_37], %94 {strides = array<i32>} : memref<4x16xf32, #tpu.memory_space<vmem>>, vector<1x16xf32>,
    %98 = arith.index_cast %c2_i32 : i32 to index
    %c0_38 = arith.constant 0 : index
    %99 = vector.load %arg10[%98, %c0_38] : memref<4x64xf32, #tpu.memory_space<vmem>>, vector<1x64xf32>
    %cst_39 = arith.constant dense<0.000000e+00> : vector<1x64xf32>
    %100 = tpu.matmul %74, %7, %cst_39 {dimension_numbers = #tpu.dot_dimension_numbers<[1], [0], [0], [1], [0, 0, 1, 1], [], []>} : vector<1x16xf32>, vector<16x64xf32>, vector<1x64xf32> -> vector<1x64xf32>
    %101 = arith.addf %99, %100 : vector<1x64xf32>
    %cst_40 = arith.constant 5.000000e-01 : f32
    %102 = vector.broadcast %cst_40 : f32 to vector<1x64xf32>
    %103 = arith.mulf %102, %101 : vector<1x64xf32>
    %104 = math.tanh %103 : vector<1x64xf32>
    %cst_41 = arith.constant 1.000000e+00 : f32
    %105 = vector.broadcast %cst_41 : f32 to vector<1x64xf32>
    %106 = arith.addf %104, %105 : vector<1x64xf32>
    %cst_42 = arith.constant 5.000000e-01 : f32
    %107 = vector.broadcast %cst_42 : f32 to vector<1x64xf32>
    %108 = arith.mulf %107, %106 : vector<1x64xf32>
    %109 = math.tanh %101 : vector<1x64xf32>
    %110 = vector.extract_strided_slice %108 {offsets = [0, 16], sizes = [1, 16], strides = [1, 1]} : vector<1x64xf32> to vector<1x16xf32>
    %111 = arith.mulf %110, %71 : vector<1x16xf32>
    %112 = vector.extract_strided_slice %108 {offsets = [0, 0], sizes = [1, 16], strides = [1, 1]} : vector<1x64xf32> to vector<1x16xf32>
    %113 = vector.extract_strided_slice %109 {offsets = [0, 32], sizes = [1, 16], strides = [1, 1]} : vector<1x64xf32> to vector<1x16xf32>
    %114 = arith.mulf %112, %113 : vector<1x16xf32>
    %115 = arith.addf %111, %114 : vector<1x16xf32>
    %116 = vector.extract_strided_slice %108 {offsets = [0, 48], sizes = [1, 16], strides = [1, 1]} : vector<1x64xf32> to vector<1x16xf32>
    %117 = math.tanh %115 : vector<1x16xf32>
    %118 = arith.mulf %116, %117 : vector<1x16xf32>
    %c3_i32 = arith.constant 3 : i32
    %119 = tpu.concatenate %118, %94 in 1 : vector<1x16xf32>, vector<1x16xf32> -> vector<1x32xf32>
    %cst_43 = arith.constant dense<0.000000e+00> : vector<1x64xf32>
    %120 = tpu.matmul %119, %8, %cst_43 {dimension_numbers = #tpu.dot_dimension_numbers<[1], [0], [0], [1], [0, 0, 1, 1], [], []>} : vector<1x32xf32>, vector<32x64xf32>, vector<1x64xf32> -> vector<1x64xf32>
    %121 = arith.addf %120, %9 : vector<1x64xf32>
    %cst_44 = arith.constant 5.000000e-01 : f32
    %122 = vector.broadcast %cst_44 : f32 to vector<1x64xf32>
    %123 = arith.mulf %122, %121 : vector<1x64xf32>
    %124 = math.tanh %123 : vector<1x64xf32>
    %cst_45 = arith.constant 1.000000e+00 : f32
    %125 = vector.broadcast %cst_45 : f32 to vector<1x64xf32>
    %126 = arith.addf %124, %125 : vector<1x64xf32>
    %cst_46 = arith.constant 5.000000e-01 : f32
    %127 = vector.broadcast %cst_46 : f32 to vector<1x64xf32>
    %128 = arith.mulf %127, %126 : vector<1x64xf32>
    %129 = math.tanh %121 : vector<1x64xf32>
    %130 = vector.extract_strided_slice %128 {offsets = [0, 16], sizes = [1, 16], strides = [1, 1]} : vector<1x64xf32> to vector<1x16xf32>
    %131 = arith.mulf %130, %91 : vector<1x16xf32>
    %132 = vector.extract_strided_slice %128 {offsets = [0, 0], sizes = [1, 16], strides = [1, 1]} : vector<1x64xf32> to vector<1x16xf32>
    %133 = vector.extract_strided_slice %129 {offsets = [0, 32], sizes = [1, 16], strides = [1, 1]} : vector<1x64xf32> to vector<1x16xf32>
    %134 = arith.mulf %132, %133 : vector<1x16xf32>
    %135 = arith.addf %131, %134 : vector<1x16xf32>
    %136 = vector.extract_strided_slice %128 {offsets = [0, 48], sizes = [1, 16], strides = [1, 1]} : vector<1x64xf32> to vector<1x16xf32>
    %137 = math.tanh %135 : vector<1x16xf32>
    %138 = arith.mulf %136, %137 : vector<1x16xf32>
    %c1_i32_47 = arith.constant 1 : i32
    %139 = arith.subi %c3_i32, %c1_i32_47 : i32
    %140 = arith.index_cast %139 : i32 to index
    %c0_48 = arith.constant 0 : index
    %141 = vector.load %arg11[%140, %c0_48] : memref<4x16xf32, #tpu.memory_space<vmem>>, vector<1x16xf32>
    tpu.vector_store %arg11[%140, %c0_48], %138 {strides = array<i32>} : memref<4x16xf32, #tpu.memory_space<vmem>>, vector<1x16xf32>,
    %142 = arith.index_cast %c3_i32 : i32 to index
    %c0_49 = arith.constant 0 : index
    %143 = vector.load %arg10[%142, %c0_49] : memref<4x64xf32, #tpu.memory_space<vmem>>, vector<1x64xf32>
    %cst_50 = arith.constant dense<0.000000e+00> : vector<1x64xf32>
    %144 = tpu.matmul %118, %7, %cst_50 {dimension_numbers = #tpu.dot_dimension_numbers<[1], [0], [0], [1], [0, 0, 1, 1], [], []>} : vector<1x16xf32>, vector<16x64xf32>, vector<1x64xf32> -> vector<1x64xf32>
    %145 = arith.addf %143, %144 : vector<1x64xf32>
    %cst_51 = arith.constant 5.000000e-01 : f32
    %146 = vector.broadcast %cst_51 : f32 to vector<1x64xf32>
    %147 = arith.mulf %146, %145 : vector<1x64xf32>
    %148 = math.tanh %147 : vector<1x64xf32>
    %cst_52 = arith.constant 1.000000e+00 : f32
    %149 = vector.broadcast %cst_52 : f32 to vector<1x64xf32>
    %150 = arith.addf %148, %149 : vector<1x64xf32>
    %cst_53 = arith.constant 5.000000e-01 : f32
    %151 = vector.broadcast %cst_53 : f32 to vector<1x64xf32>
    %152 = arith.mulf %151, %150 : vector<1x64xf32>
    %153 = math.tanh %145 : vector<1x64xf32>
    %154 = vector.extract_strided_slice %152 {offsets = [0, 16], sizes = [1, 16], strides = [1, 1]} : vector<1x64xf32> to vector<1x16xf32>
    %155 = arith.mulf %154, %115 : vector<1x16xf32>
    %156 = vector.extract_strided_slice %152 {offsets = [0, 0], sizes = [1, 16], strides = [1, 1]} : vector<1x64xf32> to vector<1x16xf32>
    %157 = vector.extract_strided_slice %153 {offsets = [0, 32], sizes = [1, 16], strides = [1, 1]} : vector<1x64xf32> to vector<1x16xf32>
    %158 = arith.mulf %156, %157 : vector<1x16xf32>
    %159 = arith.addf %155, %158 : vector<1x16xf32>
    %160 = vector.extract_strided_slice %152 {offsets = [0, 48], sizes = [1, 16], strides = [1, 1]} : vector<1x64xf32> to vector<1x16xf32>
    %161 = math.tanh %159 : vector<1x16xf32>
    %162 = arith.mulf %160, %161 : vector<1x16xf32>
    %c3_i32_54 = arith.constant 3 : i32
    %163 = tpu.concatenate %162, %138 in 1 : vector<1x16xf32>, vector<1x16xf32> -> vector<1x32xf32>
    %cst_55 = arith.constant dense<0.000000e+00> : vector<1x64xf32>
    %164 = tpu.matmul %163, %8, %cst_55 {dimension_numbers = #tpu.dot_dimension_numbers<[1], [0], [0], [1], [0, 0, 1, 1], [], []>} : vector<1x32xf32>, vector<32x64xf32>, vector<1x64xf32> -> vector<1x64xf32>
    %165 = arith.addf %164, %9 : vector<1x64xf32>
    %cst_56 = arith.constant 5.000000e-01 : f32
    %166 = vector.broadcast %cst_56 : f32 to vector<1x64xf32>
    %167 = arith.mulf %166, %165 : vector<1x64xf32>
    %168 = math.tanh %167 : vector<1x64xf32>
    %cst_57 = arith.constant 1.000000e+00 : f32
    %169 = vector.broadcast %cst_57 : f32 to vector<1x64xf32>
    %170 = arith.addf %168, %169 : vector<1x64xf32>
    %cst_58 = arith.constant 5.000000e-01 : f32
    %171 = vector.broadcast %cst_58 : f32 to vector<1x64xf32>
    %172 = arith.mulf %171, %170 : vector<1x64xf32>
    %173 = math.tanh %165 : vector<1x64xf32>
    %174 = vector.extract_strided_slice %172 {offsets = [0, 16], sizes = [1, 16], strides = [1, 1]} : vector<1x64xf32> to vector<1x16xf32>
    %175 = arith.mulf %174, %135 : vector<1x16xf32>
    %176 = vector.extract_strided_slice %172 {offsets = [0, 0], sizes = [1, 16], strides = [1, 1]} : vector<1x64xf32> to vector<1x16xf32>
    %177 = vector.extract_strided_slice %173 {offsets = [0, 32], sizes = [1, 16], strides = [1, 1]} : vector<1x64xf32> to vector<1x16xf32>
    %178 = arith.mulf %176, %177 : vector<1x16xf32>
    %179 = arith.addf %175, %178 : vector<1x16xf32>
    %180 = vector.extract_strided_slice %172 {offsets = [0, 48], sizes = [1, 16], strides = [1, 1]} : vector<1x64xf32> to vector<1x16xf32>
    %181 = math.tanh %179 : vector<1x16xf32>
    %182 = arith.mulf %180, %181 : vector<1x16xf32>
    %c3 = arith.constant 3 : index
    %c0_59 = arith.constant 0 : index
    %183 = vector.load %arg11[%c3, %c0_59] : memref<4x16xf32, #tpu.memory_space<vmem>>, vector<1x16xf32>
    tpu.vector_store %arg11[%c3, %c0_59], %182 {strides = array<i32>} : memref<4x16xf32, #tpu.memory_space<vmem>>, vector<1x16xf32>,
    %c0_60 = arith.constant 0 : index
    %c0_61 = arith.constant 0 : index
    %184 = vector.load %arg11[%c0_60, %c0_61] : memref<4x16xf32, #tpu.memory_space<vmem>>, vector<4x16xf32>
    %c0_62 = arith.constant 0 : index
    %c0_63 = arith.constant 0 : index
    %185 = vector.load %arg6[%c0_62, %c0_63] : memref<16x1xf32, #tpu.memory_space<vmem>>, vector<16x1xf32>
    %cst_64 = arith.constant dense<0.000000e+00> : vector<4x1xf32>
    %186 = tpu.matmul %184, %185, %cst_64 {dimension_numbers = #tpu.dot_dimension_numbers<[1], [0], [0], [1], [0, 0, 1, 1], [], []>} : vector<4x16xf32>, vector<16x1xf32>, vector<4x1xf32> -> vector<4x1xf32>
    %c0_65 = arith.constant 0 : index
    %c0_66 = arith.constant 0 : index
    %187 = vector.load %arg7[%c0_65, %c0_66] : memref<1x1xf32, #tpu.memory_space<vmem>>, vector<1x1xf32>
    %188 = vector.broadcast %187 : vector<1x1xf32> to vector<4x1xf32>
    %189 = arith.addf %186, %188 : vector<4x1xf32>
    %c0_67 = arith.constant 0 : index
    %c0_68 = arith.constant 0 : index
    %190 = vector.load %arg8[%c0_67, %c0_68] : memref<4x1xf32, #tpu.memory_space<vmem>>, vector<4x1xf32>
    %cst_69 = arith.constant 9.99999993E-9 : f32
    %191 = vector.broadcast %cst_69 : f32 to vector<4x1xf32>
    %192 = arith.mulf %190, %191 : vector<4x1xf32>
    %cst_70 = arith.constant 1.000000e+00 : f32
    %193 = vector.broadcast %cst_70 : f32 to vector<4x1xf32>
    %194 = arith.addf %192, %193 : vector<4x1xf32>
    %cst_71 = arith.constant 0.000000e+00 : f32
    %195 = vector.broadcast %cst_71 : f32 to vector<4x1xf32>
    %196 = arith.maximumf %194, %195 : vector<4x1xf32>
    %197 = arith.mulf %189, %196 : vector<4x1xf32>
    %c0_72 = arith.constant 0 : index
    %c0_73 = arith.constant 0 : index
    %198 = vector.load %arg9[%c0_72, %c0_73] : memref<4x1xf32, #tpu.memory_space<vmem>>, vector<4x1xf32>
    tpu.vector_store %arg9[%c0_72, %c0_73], %197 {strides = array<i32>} : memref<4x1xf32, #tpu.memory_space<vmem>>, vector<4x1xf32>,
    return
  }
}

</mosaic_0001>

<bundles_post_ra>
// kernel: mycnn_forward.2
= control target key start
LH: loop header
LB: loop body
LE: loop exit
PB: predicated region body
PF: predicated region fallthrough
CT: control target
= control target key end

     0   :  { %s1979_s20 = smov 0   ;;  %s3061_s0 = inlined_call_operand.vmem [shape: f32[4,120,10], index: 0, kind: input, shape index: {}]   ;;  %s3062_s1 = inlined_call_operand.vmem [shape: f32[100,4], index: 1, kind: input, shape index: {}]   ;;  %s3063_s2 = inlined_call_operand.vmem [shape: f32[1,4], index: 2, kind: input, shape index: {}]   ;;  %s3064_s3 = inlined_call_operand.vmem [shape: f32[20,1], index: 3, kind: input, shape index: {}]   ;;  %s3065_s4 = inlined_call_operand.<no memory space> [shape: f32[1,1], index: 4, kind: input, shape index: {}]   ;;  %s3066_s5 = inlined_call_operand.vmem [shape: f32[4,25,1], index: 5, kind: output, shape index: {}]  }
   0x1   :  { %v10_v0 = vstv %s3065_s4 }
   0x2   :  { %11 = vst [vmem:[#allocation4] sm:$0x1] %v10_v0 }
   0x3 LB: > { %s1681_s21 = sadd.s32 4294967295, %s1928_s20   ;;  %p1685_p0 = scmp.ge.s32.totalorder %s1928_s20, 1  ;;  %s1928_s20 = sphi %s1979_s20, %s17_s20  }
   0x4   : > { %p189_p1 = scmp.lt.s32.totalorder %s1928_s20, 5 }
   0x6   : > { %p190_p2 = pnand %p1685_p0, %p189_p1 }
   0x7   : > { %p217_p3 = scmp.lt.s32.totalorder (!%p190_p2), %s1681_s21, 3  ;;  %vm327_vm0 = vcmask (!%p190_p2), 1045504   ;;  %vm256_vm1 = vcmask (!%p190_p2), 1046528   ;;  %s1930_s25 = smov (!%p190_p2), 20   ;;  %vm3069_vm2 = vcmask (!%p190_p2), 1044480   ;;  %vm3068_vm3 = vcmask (!%p190_p2), 1043456  }
   0x8   : > { %193 = sbr.rel (%p190_p2) target bundleno = 1002 (0x3ea), region = 40  ;;  %s1931_s26 = smov (!%p190_p2), 10   ;;  %vm3067_vm4 = vcmask (!%p190_p2), 1042432   ;;  %vm615_vm5 = vcmask (!%p190_p2), 1041408   ;;  %vm687_vm6 = vcmask (!%p190_p2), 1040384   ;;  %v980_v47 = vld [vmem:[%s3062_s1] sm:$0xff] (!%p190_p2) }
   0x9   : > { %s1932_s27 = smov (!%p190_p2), 30   ;;  %s1933_s28 = smov (!%p190_p2), 40   ;;  %v981_v48 = vld [vmem:[%s3062_s1 + $0x8] sm:$0xff] (!%p190_p2)  ;;  %v982_v49 = vld [vmem:[%s3062_s1 + $0x10] sm:$0xff] (!%p190_p2)  ;;  %v983_v50 = vld [vmem:[%s3062_s1 + $0x18] sm:$0xff] (!%p190_p2)  ;;  %vm845_vm7 = vcmask (!%p190_p2), 80896  }
   0xa   : > { %s1934_s29 = smov (!%p190_p2), 50   ;;  %s1935_s30 = smov (!%p190_p2), 60   ;;  %v1828_v55 = vpack.c.bf16 (!%p190_p2), %v981_v48, %v980_v47  ;;  %v1832_v56 = vpack.c.bf16 (!%p190_p2), %v983_v50, %v982_v49  ;;  %v984_v57 = vld [vmem:[%s3062_s1 + $0x20] sm:$0xff] (!%p190_p2)  ;;  %v985_v58 = vld [vmem:[%s3062_s1 + $0x28] sm:$0xff] (!%p190_p2)  ;;  %v986_v0 = vld [vmem:[%s3062_s1 + $0x30] sm:$0xff] (!%p190_p2)  ;;  %vm860_vm8 = vcmask (!%p190_p2), 162816  }
   0xb   : > { %s1936_s14 = smov (!%p190_p2), 70   ;;  %v1836_v63 = vpack.c.bf16 (!%p190_p2), %v985_v58, %v984_v57  ;;  %s1937_s6 = smov (!%p190_p2), 80   ;;  %vm875_vm9 = vcmask (!%p190_p2), 244736   ;;  %vm890_vm10 = vcmask (!%p190_p2), 326656   ;;  %vm905_vm11 = vcmask (!%p190_p2), 408576  }
   0xc   : > { %1829 = vmatprep.subr.bf16.mxu0 (!%p190_p2), %v1828_v55  ;;  %s1938_s16 = smov (!%p190_p2), 90   ;;  %vm920_vm12 = vcmask (!%p190_p2), 490496   ;;  %vm935_vm13 = vcmask (!%p190_p2), 572416   ;;  %vm950_vm14 = vcmask (!%p190_p2), 654336   ;;  %vm965_vm15 = vcmask (!%p190_p2), 736256   ;;  %s1942_s19 = smov (!%p190_p2), 8  }
   0xd   : > { %1831 = vmatpush3.bf16.msra.mxu0 (!%p190_p2), %v1828_v55  ;;  %s1944_s22 = smov (!%p190_p2), 16   ;;  %s1945_s23 = smov (!%p190_p2), 12  }
   0xe   : > { %1833 = vmatprep.subr.bf16.mxu0 (!%p190_p2), %v1832_v56 }
   0xf   : > { %s3089_s21 = smov (!%p217_p3, %s1681_s21), 3 }
  0x10   : > { %s1855_s4 = smul.u32 120, %s3089_s21 }
  0x11   : > { %1835 = vmatpush3.bf16.msra.mxu0 %v1832_v56 }
  0x12   : > { %s1993_s24 = scalar_lea.vmem %s3061_s0, %s1855_s4  ;;  %1837 = vmatprep.subr.bf16.mxu0 %v1836_v63  ;;  %s1943_s4 = smov 4  }
  0x13   : > { %v1996_v1 = vld [vmem:[%s1993_s24] sm:$0xff]  ;;  %v1999_v2 = vld [vmem:[%s1993_s24 + $0x8] sm:$0xff]  ;;  %v2002_v3 = vld [vmem:[%s1993_s24 + $0x10] sm:$0xff] }
  0x14   : > { %v328_v4 = vrot.slane %v1996_v1, 2  ;;  %v329_v5 = vrot.slane %v1999_v2, 2  ;;  %v257_v6 = vrot.slane %v1996_v1, 1  ;;  %v258_v7 = vrot.slane %v1999_v2, 1  ;;  %v2022_v17 = vld [vmem:[%s1993_s24 + $0x18] sm:$0xff]  ;;  %v2042_v28 = vld [vmem:[%s1993_s24 + $0x20] sm:$0xff] }
  0x15   : > { %v331_v8 = vrot.slane %v2002_v3, 2  ;;  %v260_v9 = vrot.slane %v2002_v3, 1  ;;  %v401_v12 = vrot.slane %v1999_v2, 3  ;;  %v403_v15 = vrot.slane %v2002_v3, 3  ;;  %v2114_v62 = vld [vmem:[%s1993_s24 + $0x28] sm:$0xff]  ;;  %1839 = vmatpush3.bf16.msra.mxu0 %v1836_v63 }
  0x16   : > { %v330_v10 = vsel %vm327_vm0, %v328_v4, %v329_v5  ;;  %v259_v11 = vsel %vm256_vm1, %v257_v6, %v258_v7  ;;  %v400_v16 = vrot.slane %v1996_v1, 3  ;;  %v262_v18 = vrot.slane %v2022_v17, 1  ;;  %v987_v4 = vld [vmem:[%s3062_s1 + $0x38] sm:$0xff] }
  0x17   : > { %357 = vrot.lane.b32.xlu1 %v330_v10, %s1930_s25  ;;  %284 = vrot.lane.b32.xlu0 %v259_v11, %s1931_s26  ;;  %v332_v13 = vsel %vm327_vm0, %v329_v5, %v331_v8  ;;  %v2017_v14 = vsel %vm256_vm1, %v258_v7, %v260_v9  ;;  %v404_v19 = vsel %vm3069_vm2, %v401_v12, %v403_v15  ;;  %v472_v21 = vrot.slane %v1996_v1, 4  ;;  %v989_v10 = vld [vmem:[%s3062_s1 + $0x48] sm:$0xff] }
  0x18   : > { %v402_v20 = vsel %vm3069_vm2, %v400_v16, %v401_v12  ;;  %v473_v22 = vrot.slane %v1999_v2, 4  ;;  %v2035_v23 = vsel %vm256_vm1, %v260_v9, %v262_v18  ;;  %v544_v25 = vrot.slane %v1996_v1, 5  ;;  %v988_v9 = vld [vmem:[%s3062_s1 + $0x40] sm:$0xff] }
  0x19   : > { %v545_v26 = vrot.slane %v1999_v2, 5  ;;  %v475_v27 = vrot.slane %v2002_v3, 4  ;;  %v333_v31 = vrot.slane %v2022_v17, 2  ;;  %v264_v32 = vrot.slane %v2042_v28, 1 }
  0x1a   : > { %v474_v24 = vsel %vm3068_vm3, %v472_v21, %v473_v22  ;;  %v616_v33 = vrot.slane %v1996_v1, 6  ;;  %v617_v36 = vrot.slane %v1999_v2, 6  ;;  %v547_v37 = vrot.slane %v2002_v3, 5 }
  0x1b   : > { %359 = vrot.lane.b32.xlu1 %v332_v13, %s1930_s25  ;;  %286 = vrot.lane.b32.xlu0 %v2017_v14, %s1931_s26  ;;  %v546_v29 = vsel %vm3067_vm4, %v544_v25, %v545_v26  ;;  %v476_v30 = vsel %vm3068_vm3, %v473_v22, %v475_v27  ;;  %v334_v34 = vsel %vm327_vm0, %v331_v8, %v333_v31  ;;  %v405_v38 = vrot.slane %v2022_v17, 3 }
  0x1c   : > { %v2058_v35 = vsel %vm256_vm1, %v262_v18, %v264_v32  ;;  %v618_v39 = vsel %vm615_vm5, %v616_v33, %v617_v36  ;;  %v548_v40 = vsel %vm3067_vm4, %v545_v26, %v547_v37  ;;  %v335_v41 = vrot.slane %v2042_v28, 2  ;;  %v990_v18 = vld [vmem:[%s3062_s1 + $0x50] sm:$0xff] }
  0x1d   : > { %v406_v42 = vsel %vm3069_vm2, %v403_v15, %v405_v38  ;;  %v688_v44 = vrot.slane %v1996_v1, 7  ;;  %v689_v45 = vrot.slane %v1999_v2, 7  ;;  %v619_v46 = vrot.slane %v2002_v3, 6  ;;  %v2148_v15 = vld [vmem:[%s1993_s24 + $0x30] sm:$0xff] }
  0x1e   : > { %v336_v43 = vsel %vm327_vm0, %v333_v31, %v335_v41  ;;  %v477_v53 = vrot.slane %v2022_v17, 4  ;;  %v407_v54 = vrot.slane %v2042_v28, 3  ;;  %v691_v61 = vrot.slane %v2002_v3, 7 }
  0x1f   : > { %431 = vrot.lane.b32.xlu1 %v404_v19, %s1932_s27  ;;  %429 = vrot.lane.b32.xlu0 %v402_v20, %s1932_s27  ;;  %v690_v51 = vsel %vm687_vm6, %v688_v44, %v689_v45  ;;  %v620_v52 = vsel %vm615_vm5, %v617_v36, %v619_v46  ;;  %v479_v6 = vrot.slane %v2042_v28, 4  ;;  %v266_v7 = vrot.slane %v2114_v62, 1  ;;  %v991_v19 = vld [vmem:[%s3062_s1 + $0x58] sm:$0xff] }
  0x20   : > { %v478_v59 = vsel %vm3068_vm3, %v475_v27, %v477_v53  ;;  %v408_v60 = vsel %vm3069_vm2, %v405_v38, %v407_v54  ;;  %v692_v5 = vsel %vm687_vm6, %v689_v45, %v691_v61  ;;  %v1840_v8 = vpack.c.bf16 %v987_v4, %v986_v0  ;;  %v992_v27 = vld [vmem:[%s3062_s1 + $0x60] sm:$0xf]  ;;  %v2217_v45 = vld [vmem:[%s1993_s24 + $0x38] sm:$0xff] }
  0x21   : > { %v480_v11 = vsel %vm3068_vm3, %v477_v53, %v479_v6  ;;  %v2144_v12 = vsel %vm256_vm1, %v264_v32, %v266_v7  ;;  %v549_v13 = vrot.slane %v2022_v17, 5  ;;  %v1844_v16 = vpack.c.bf16 %v989_v10, %v988_v9 }
  0x22   : > { %1841 = vmatprep.subr.bf16.mxu0 %v1840_v8  ;;  %v268_v21 = vrot.slane %v2148_v15, 1  ;;  %v1848_v22 = vpack.c.bf16 %v991_v19, %v990_v18  ;;  %v551_v25 = vrot.slane %v2042_v28, 5  ;;  %v337_v26 = vrot.slane %v2114_v62, 2 }
  0x23   : > { %288 = vrot.lane.b32.xlu1 %v2035_v23, %s1931_s26  ;;  %501 = vrot.lane.b32.xlu0 %v474_v24, %s1933_s28  ;;  %v550_v20 = vsel %vm3067_vm4, %v547_v37, %v549_v13  ;;  %v621_v31 = vrot.slane %v2022_v17, 6  ;;  %v409_v32 = vrot.slane %v2114_v62, 3  ;;  %v339_v33 = vrot.slane %v2148_v15, 2 }
  0x24   : > { %1843 = vmatpush3.bf16.msra.mxu0 %v1840_v8  ;;  %v2167_v24 = vsel %vm256_vm1, %v266_v7, %v268_v21  ;;  %v693_v37 = vrot.slane %v2022_v17, 7  ;;  %v623_v38 = vrot.slane %v2042_v28, 6  ;;  %v695_v44 = vrot.slane %v2042_v28, 7 }
  0x25   : > { %1845 = vmatprep.subr.bf16.mxu0 %v1844_v16  ;;  %v340_v36 = vsel %vm327_vm0, %v337_v26, %v339_v33  ;;  %v483_v47 = vrot.slane %v2148_v15, 4  ;;  %v270_v48 = vrot.slane %v2217_v45, 1  ;;  %v555_v56 = vrot.slane %v2148_v15, 5 }
  0x26   : > { %v341_v57 = vrot.slane %v2217_v45, 2  ;;  %v413_v63 = vrot.slane %v2217_v45, 3  ;;  %v485_v9 = vrot.slane %v2217_v45, 4 }
  0x27   : > { %573 = vrot.lane.b32.xlu1 %v546_v29, %s1934_s29  ;;  %503 = vrot.lane.b32.xlu0 %v476_v30, %s1933_s28  ;;  %v552_v29 = vsel %vm3067_vm4, %v549_v13, %v551_v25  ;;  %v338_v30 = vsel %vm327_vm0, %v335_v41, %v337_v26  ;;  %v411_v41 = vrot.slane %v2148_v15, 3  ;;  %v2229_v50 = vsel %vm256_vm1, %v268_v21, %v270_v48 }
  0x28   : > { %1847 = vmatpush3.bf16.msra.mxu0 %v1844_v16  ;;  %v699_v13 = vrot.slane %v2148_v15, 7  ;;  %v2279_v16 = vld [vmem:[%s1993_s24 + $0x48] sm:$0xff] }
  0x29   : > { %1849 = vmatprep.subr.bf16.mxu0 %v1848_v22 }
  0x2b   : > { %361 = vrot.lane.b32.xlu1 %v334_v34, %s1930_s25  ;;  %290 = vrot.lane.b32.xlu0 %v2058_v35, %s1931_s26  ;;  %v410_v34 = vsel %vm3069_vm2, %v407_v54, %v409_v32 }
  0x2c   : > { %1851 = vmatpush3.bf16.msra.mxu0 %v1848_v22 }
  0x2d   : > { %1778 = vmatprep.subr.msk.mxu0 %vm3068_vm3, %v992_v27 }
  0x2f   : > { %645 = vrot.lane.b32.xlu1 %v618_v39, %s1935_s30  ;;  %575 = vrot.lane.b32.xlu0 %v548_v40, %s1934_s29  ;;  %v624_v39 = vsel %vm615_vm5, %v621_v31, %v623_v38  ;;  %v481_v40 = vrot.slane %v2114_v62, 4 }
  0x30   : > { %1779 = vmatpush3.msk.msra.mxu0 %vm3068_vm3, %v992_v27 }
  0x31   : > { %v484_v49 = vsel %vm3068_vm3, %v481_v40, %v483_v47 }
  0x33   : > { %433 = vrot.lane.b32.xlu1 %v406_v42, %s1932_s27  ;;  %363 = vrot.lane.b32.xlu0 %v336_v43, %s1930_s25  ;;  %v482_v42 = vsel %vm3068_vm3, %v479_v6, %v481_v40  ;;  %v412_v43 = vsel %vm3069_vm2, %v409_v32, %v411_v41  ;;  %v627_v6 = vrot.slane %v2148_v15, 6  ;;  %v629_v40 = vrot.slane %v2217_v45, 6 }
  0x37   : > { %717 = vrot.lane.b32.xlu1 %v690_v51, %s1936_s14  ;;  %647 = vrot.lane.b32.xlu0 %v620_v52, %s1935_s30  ;;  %v553_v51 = vrot.slane %v2114_v62, 5  ;;  %v2233_v52 = vld [vmem:[%s1993_s24 + $0x40] sm:$0xff] }
  0x38   : > { %v272_v54 = vrot.slane %v2233_v52, 1  ;;  %v343_v0 = vrot.slane %v2233_v52, 2  ;;  %v415_v10 = vrot.slane %v2233_v52, 3  ;;  %v487_v19 = vrot.slane %v2233_v52, 4 }
  0x39   : > { %v554_v53 = vsel %vm3067_vm4, %v551_v25, %v553_v51  ;;  %v556_v58 = vsel %vm3067_vm4, %v553_v51, %v555_v56  ;;  %v557_v25 = vrot.slane %v2217_v45, 5  ;;  %v701_v51 = vrot.slane %v2217_v45, 7 }
  0x3a   : > { %v2244_v55 = vsel %vm256_vm1, %v270_v48, %v272_v54  ;;  %v344_v4 = vsel %vm327_vm0, %v341_v57, %v343_v0  ;;  %v488_v21 = vsel %vm3068_vm3, %v485_v9, %v487_v19 }
  0x3b   : > { %505 = vrot.lane.b32.xlu1 %v478_v59, %s1933_s28  ;;  %435 = vrot.lane.b32.xlu0 %v408_v60, %s1932_s27  ;;  %v342_v59 = vsel %vm327_vm0, %v339_v33, %v341_v57  ;;  %v625_v60 = vrot.slane %v2114_v62, 6 }
  0x3d   : > { %v628_v8 = vsel %vm615_vm5, %v625_v60, %v627_v6 }
  0x3f   : > { %759 = vrot.lane.b32.xlu1 %v1999_v2, %s1937_s6  ;;  %719 = vrot.lane.b32.xlu0 %v692_v5, %s1936_s14  ;;  %v697_v5 = vrot.slane %v2114_v62, 7 }
  0x41   : > { %v698_v7 = vsel %vm687_vm6, %v695_v44, %v697_v5  ;;  %v700_v18 = vsel %vm687_vm6, %v697_v5, %v699_v13 }
  0x43   : > { %507 = vrot.lane.b32.xlu1 %v480_v11, %s1933_s28  ;;  %292 = vrot.lane.b32.xlu0 %v2144_v12, %s1931_s26  ;;  %v486_v11 = vsel %vm3068_vm3, %v483_v47, %v485_v9 }
  0x47   : > { %761 = vrot.lane.b32.xlu1 %v2002_v3, %s1937_s6  ;;  %577 = vrot.lane.b32.xlu0 %v550_v20, %s1934_s29  ;;  %v274_v20 = vrot.slane %v2279_v16, 1 }
  0x49   : > { %v2291_v22 = vsel %vm256_vm1, %v272_v54, %v274_v20 }
  0x4b   : > { %294 = vrot.lane.b32.xlu1 %v2167_v24, %s1931_s26  ;;  %803 = vrot.lane.b32.xlu0 %v2017_v14, %s1938_s16  ;;  %v622_v14 = vsel %vm615_vm5, %v619_v46, %v621_v31  ;;  %v696_v46 = vsel %vm687_vm6, %v693_v37, %v695_v44  ;;  %v417_v44 = vrot.slane %v2279_v16, 3 }
  0x4d   : > { %v418_v48 = vsel %vm3069_vm2, %v415_v10, %v417_v44 }
  0x4f   : > { %579 = vrot.lane.b32.xlu1 %v552_v29, %s1934_s29  ;;  %365 = vrot.lane.b32.xlu0 %v338_v30, %s1930_s25  ;;  %v2299_v29 = vld [vmem:[%s1993_s24 + $0x50] sm:$0xff]  ;;  %v558_v30 = vsel %vm3067_vm4, %v555_v56, %v557_v25 }
  0x50   : > { %v276_v31 = vrot.slane %v2299_v29, 1 }
  0x52   : > { %v2314_v33 = vsel %vm256_vm1, %v274_v20, %v276_v31 }
  0x53   : > { %805 = vrot.lane.b32.xlu1 %v2035_v23, %s1938_s16  ;;  %649 = vrot.lane.b32.xlu0 %v622_v14, %s1935_s30  ;;  %v694_v23 = vsel %vm687_vm6, %v691_v61, %v693_v37  ;;  %v626_v61 = vsel %vm615_vm5, %v623_v38, %v625_v60 }
  0x57   : > { %437 = vrot.lane.b32.xlu1 %v410_v34, %s1932_s27  ;;  %367 = vrot.lane.b32.xlu0 %v340_v36, %s1930_s25  ;;  %v559_v34 = vrot.slane %v2233_v52, 5  ;;  %v345_v36 = vrot.slane %v2279_v16, 2 }
  0x5b   : > { %721 = vrot.lane.b32.xlu1 %v694_v23, %s1936_s14  ;;  %651 = vrot.lane.b32.xlu0 %v624_v39, %s1935_s30  ;;  %v560_v23 = vsel %vm3067_vm4, %v557_v25, %v559_v34  ;;  %v346_v39 = vsel %vm327_vm0, %v343_v0, %v345_v36 }
  0x5f   : > { %509 = vrot.lane.b32.xlu1 %v482_v42, %s1933_s28  ;;  %439 = vrot.lane.b32.xlu0 %v412_v43, %s1932_s27  ;;  %v630_v43 = vsel %vm615_vm5, %v627_v6, %v629_v40  ;;  %v2377_v6 = vld [vmem:[%s1993_s24 + $0x58] sm:$0xff] }
  0x60   : > { %v278_v9 = vrot.slane %v2377_v6, 1 }
  0x63   : > { %763 = vrot.lane.b32.xlu1 %v2022_v17, %s1937_s6  ;;  %723 = vrot.lane.b32.xlu0 %v696_v46, %s1936_s14 }
  0x67   : > { %511 = vrot.lane.b32.xlu1 %v484_v49, %s1933_s28  ;;  %296 = vrot.lane.b32.xlu0 %v2229_v50, %s1931_s26 }
  0x6b   : > { %765 = vrot.lane.b32.xlu1 %v2042_v28, %s1937_s6  ;;  %581 = vrot.lane.b32.xlu0 %v554_v53, %s1934_s29  ;;  %v631_v53 = vrot.slane %v2233_v52, 6 }
  0x6d   : > { %v632_v57 = vsel %vm615_vm5, %v629_v40, %v631_v53  ;;  %v349_v40 = vrot.slane %v2377_v6, 2 }
  0x6f   : > { %298 = vrot.lane.b32.xlu1 %v2244_v55, %s1931_s26  ;;  %807 = vrot.lane.b32.xlu0 %v2058_v35, %s1938_s16  ;;  %v414_v35 = vsel %vm3069_vm2, %v411_v41, %v413_v63 }
  0x73   : > { %583 = vrot.lane.b32.xlu1 %v556_v58, %s1934_s29  ;;  %369 = vrot.lane.b32.xlu0 %v342_v59, %s1930_s25  ;;  %v489_v58 = vrot.slane %v2279_v16, 4  ;;  %v419_v59 = vrot.slane %v2299_v29, 3 }
  0x75   : > { %v420_v0 = vsel %vm3069_vm2, %v417_v44, %v419_v59 }
  0x77   : > { %809 = vrot.lane.b32.xlu1 %v2144_v12, %s1938_s16  ;;  %653 = vrot.lane.b32.xlu0 %v626_v61, %s1935_s30  ;;  %v416_v12 = vsel %vm3069_vm2, %v413_v63, %v415_v10  ;;  %v490_v63 = vsel %vm3068_vm3, %v487_v19, %v489_v58 }
  0x7b   : > { %441 = vrot.lane.b32.xlu1 %v414_v35, %s1932_s27  ;;  %371 = vrot.lane.b32.xlu0 %v344_v4, %s1930_s25  ;;  %v703_v35 = vrot.slane %v2233_v52, 7 }
  0x7f   : > { %725 = vrot.lane.b32.xlu1 %v698_v7, %s1936_s14  ;;  %655 = vrot.lane.b32.xlu0 %v628_v8, %s1935_s30  ;;  %v704_v7 = vsel %vm687_vm6, %v701_v51, %v703_v35  ;;  %v491_v8 = vrot.slane %v2299_v29, 4 }
  0x83   : > { %513 = vrot.lane.b32.xlu1 %v486_v11, %s1933_s28  ;;  %443 = vrot.lane.b32.xlu0 %v416_v12, %s1932_s27  ;;  %v492_v12 = vsel %vm3068_vm3, %v489_v58, %v491_v8 }
  0x87   : > { %767 = vrot.lane.b32.xlu1 %v2114_v62, %s1937_s6  ;;  %727 = vrot.lane.b32.xlu0 %v700_v18, %s1936_s14  ;;  %v561_v18 = vrot.slane %v2279_v16, 5 }
  0x89   : > { %v2294_v26 = vpop.permute.xlu1 %357  ;;  %v2296_v27 = vpop.permute.xlu0 %284  ;;  %v562_v25 = vsel %vm3067_vm4, %v559_v34, %v561_v18  ;;  %v563_v34 = vrot.slane %v2299_v29, 5 }
  0x8b   : > { %515 = vrot.lane.b32.xlu1 %v488_v21, %s1933_s28  ;;  %300 = vrot.lane.b32.xlu0 %v2291_v22, %s1931_s26  ;;  %v2403_v21 = vld [vmem:[%s1993_s24 + $0x60] sm:$0xff] }
  0x8d   : > { %v2306_v14 = vpop.permute.xlu1 %359  ;;  %v2308_v32 = vpop.permute.xlu0 %286 }
  0x8f   : > { %769 = vrot.lane.b32.xlu1 %v2148_v15, %s1937_s6  ;;  %585 = vrot.lane.b32.xlu0 %v558_v30, %s1934_s29  ;;  %v280_v30 = vrot.slane %v2403_v21, 1 }
  0x91   : > { %v2318_v37 = vpop.permute.xlu1 %431  ;;  %v2320_v38 = vpop.permute.xlu0 %429 }
  0x93   : > { %302 = vrot.lane.b32.xlu1 %v2314_v33, %s1931_s26  ;;  %811 = vrot.lane.b32.xlu0 %v2167_v24, %s1938_s16  ;;  %v347_v24 = vrot.slane %v2299_v29, 2 }
  0x95   : > { %v2329_v41 = vpop.permute.xlu1 %288  ;;  %v2331_v42 = vpop.permute.xlu0 %501  ;;  %v348_v49 = vsel %vm327_vm0, %v345_v36, %v347_v24 }
  0x97   : > { %587 = vrot.lane.b32.xlu1 %v560_v23, %s1934_s29  ;;  %373 = vrot.lane.b32.xlu0 %v346_v39, %s1930_s25  ;;  %v846_v23 = vsel %vm845_vm7, %v1996_v1, %v2296_v27  ;;  %v2419_v39 = vsel %vm256_vm1, %v278_v9, %v280_v30  ;;  %v633_v1 = vrot.slane %v2279_v16, 6 }
  0x99   : > { %v2338_v46 = vpop.permute.xlu1 %573  ;;  %v2340_v47 = vpop.permute.xlu0 %503 }
  0x9b   : > { %813 = vrot.lane.b32.xlu1 %v2229_v50, %s1938_s16  ;;  %657 = vrot.lane.b32.xlu0 %v630_v43, %s1935_s30  ;;  %v702_v50 = vsel %vm687_vm6, %v699_v13, %v701_v51  ;;  %v2395_v13 = vsel %vm256_vm1, %v276_v31, %v278_v9 }
  0x9d   : > { %v2351_v54 = vpop.permute.xlu1 %361  ;;  %v2353_v56 = vpop.permute.xlu0 %290 }
  0x9f   : > { %445 = vrot.lane.b32.xlu1 %v418_v48, %s1932_s27  ;;  %375 = vrot.lane.b32.xlu0 %v348_v49, %s1930_s25  ;;  %v861_v48 = vsel %vm860_vm8, %v846_v23, %v2294_v26  ;;  %v564_v49 = vsel %vm3067_vm4, %v561_v18, %v563_v34  ;;  %v350_v26 = vsel %vm327_vm0, %v347_v24, %v349_v40  ;;  %vm1000_vm4 = vcmask 818176  }
  0xa0   : > { %v876_v27 = vsel %vm875_vm9, %v861_v48, %v2320_v38  ;;  %v634_v24 = vsel %vm615_vm5, %v631_v53, %v633_v1 }
  0xa1   : > { %v646_v60 = vpop.permute.xlu1 %645  ;;  %v2363_v61 = vpop.permute.xlu0 %575  ;;  %v891_v51 = vsel %vm890_vm10, %v876_v27, %v2331_v42  ;;  %v847_v42 = vsel %vm845_vm7, %v1999_v2, %v2308_v32  ;;  %v705_v2 = vrot.slane %v2279_v16, 7 }
  0xa2   : > { %v862_v53 = vsel %vm860_vm8, %v847_v42, %v2306_v14 }
  0xa3   : > { %729 = vrot.lane.b32.xlu1 %v702_v50, %s1936_s14  ;;  %659 = vrot.lane.b32.xlu0 %v632_v57, %s1935_s30  ;;  %v906_v57 = vsel %vm905_vm11, %v891_v51, %v2338_v46  ;;  %v421_v46 = vrot.slane %v2377_v6, 3  ;;  %v877_v32 = vsel %vm875_vm9, %v862_v53, %v2318_v37 }
  0xa4   : > { %v921_v38 = vsel %vm920_vm12, %v906_v57, %v646_v60  ;;  %v495_v57 = vrot.slane %v2403_v21, 4 }
  0xa5   : > { %v2372_v4 = vpop.permute.xlu1 %433  ;;  %v2374_v5 = vpop.permute.xlu0 %363 }
  0xa7   : > { %517 = vrot.lane.b32.xlu1 %v490_v63, %s1933_s28  ;;  %447 = vrot.lane.b32.xlu0 %v420_v0, %s1932_s27  ;;  %v351_v63 = vrot.slane %v2403_v21, 2 }
  0xa9   : > { %v718_v10 = vpop.permute.xlu1 %717  ;;  %v2386_v11 = vpop.permute.xlu0 %647  ;;  %v352_v14 = vsel %vm327_vm0, %v349_v40, %v351_v63  ;;  %v423_v40 = vrot.slane %v2403_v21, 3 }
  0xaa   : > { %v936_v58 = vsel %vm935_vm13, %v921_v38, %v718_v10  ;;  %v422_v10 = vsel %vm3069_vm2, %v419_v59, %v421_v46  ;;  %v706_v59 = vsel %vm687_vm6, %v703_v35, %v705_v2 }
  0xab   : > { %771 = vrot.lane.b32.xlu1 %v2217_v45, %s1937_s6  ;;  %731 = vrot.lane.b32.xlu0 %v704_v7, %s1936_s14 }
  0xad   : > { %v2398_v19 = vpop.permute.xlu1 %505  ;;  %v2400_v20 = vpop.permute.xlu0 %435 }
  0xaf   : > { %519 = vrot.lane.b32.xlu1 %v492_v12, %s1933_s28  ;;  %304 = vrot.lane.b32.xlu0 %v2395_v13, %s1931_s26  ;;  %v635_v12 = vrot.slane %v2299_v29, 6 }
  0xb1   : > { %v760_v31 = vpop.permute.xlu1 %759  ;;  %v720_v36 = vpop.permute.xlu0 %719  ;;  %v636_v23 = vsel %vm615_vm5, %v633_v1, %v635_v12  ;;  %v707_v1 = vrot.slane %v2299_v29, 7 }
  0xb2   : > { %v951_v60 = vsel %vm950_vm14, %v936_v58, %v760_v31 }
  0xb3   : > { %773 = vrot.lane.b32.xlu1 %v2233_v52, %s1937_s6  ;;  %589 = vrot.lane.b32.xlu0 %v562_v25, %s1934_s29 }
  0xb5   : > { %v2423_v43 = vpop.permute.xlu1 %507  ;;  %v2425_v44 = vpop.permute.xlu0 %292 }
  0xb7   : > { %306 = vrot.lane.b32.xlu1 %v2419_v39, %s1931_s26  ;;  %815 = vrot.lane.b32.xlu0 %v2244_v55, %s1938_s16 }
  0xb9   : > { %v762_v50 = vpop.permute.xlu1 %761  ;;  %v2444_v55 = vpop.permute.xlu0 %577 }
  0xbb   : > { %591 = vrot.lane.b32.xlu1 %v564_v49, %s1934_s29  ;;  %377 = vrot.lane.b32.xlu0 %v350_v26, %s1930_s25 }
  0xbd   : > { %v2461_v0 = vpop.permute.xlu1 %294  ;;  %v804_v7 = vpop.permute.xlu0 %803 }
  0xbe   : > { %v966_v9 = vsel %vm965_vm15, %v951_v60, %v804_v7  ;;  %v565_v60 = vrot.slane %v2377_v6, 5 }
  0xbf   : > { %817 = vrot.lane.b32.xlu1 %v2291_v22, %s1938_s16  ;;  %661 = vrot.lane.b32.xlu0 %v634_v24, %s1935_s30  ;;  %v892_v22 = vsel %vm890_vm10, %v877_v32, %v2340_v47 }
  0xc0   : > { %1780 = vmatprep.mubr.msk.f32.mxu0 %vm1000_vm4, %v966_v9  ;;  %v907_v37 = vsel %vm905_vm11, %v892_v22, %v2363_v61  ;;  %v493_v61 = vrot.slane %v2377_v6, 4 }
  0xc1   : > { %v2482_v18 = vpop.permute.xlu1 %579  ;;  %v2484_v25 = vpop.permute.xlu0 %365  ;;  %v922_v31 = vsel %vm920_vm12, %v907_v37, %v2386_v11 }
  0xc2   : > { %v937_v47 = vsel %vm935_vm13, %v922_v31, %v720_v36  ;;  %v494_v35 = vsel %vm3068_vm3, %v491_v8, %v493_v61  ;;  %v424_v36 = vsel %vm3069_vm2, %v421_v46, %v423_v40  ;;  %v708_v8 = vsel %vm687_vm6, %v705_v2, %v707_v1 }
  0xc3   : > { %449 = vrot.lane.b32.xlu1 %v422_v10, %s1932_s27  ;;  %379 = vrot.lane.b32.xlu0 %v352_v14, %s1930_s25  ;;  %v952_v11 = vsel %vm950_vm14, %v937_v47, %v762_v50  ;;  %v2518_v50 = vld [vmem:[%s1993_s24 + $0x68] sm:$0xff]  ;;  %v496_v58 = vsel %vm3068_vm3, %v493_v61, %v495_v57  ;;  %vm3070_vm3 = vcmask 1042432  }
  0xc4   : > { %v2527_v38 = vrot.slane %v2518_v50, 1  ;;  %v566_v53 = vsel %vm3070_vm3, %v563_v34, %v565_v60  ;;  %v353_v10 = vrot.slane %v2518_v50, 2  ;;  %v848_v34 = vsel %vm845_vm7, %v2002_v3, %v2329_v41 }
  0xc5   : > { %v806_v48 = vpop.permute.xlu1 %805  ;;  %v650_v27 = vpop.permute.xlu0 %649  ;;  %v863_v37 = vsel %vm860_vm8, %v848_v34, %v2351_v54  ;;  %v637_v41 = vrot.slane %v2377_v6, 6 }
  0xc6   : > { %v967_v49 = vsel %vm965_vm15, %v952_v11, %v806_v48  ;;  %v2539_v46 = vsel %vm256_vm1, %v280_v30, %v2527_v38  ;;  %v567_v30 = vrot.slane %v2403_v21, 5  ;;  %v878_v31 = vsel %vm875_vm9, %v863_v37, %v2372_v4 }
  0xc7   : > { %733 = vrot.lane.b32.xlu1 %v706_v59, %s1936_s14  ;;  %663 = vrot.lane.b32.xlu0 %v636_v23, %s1935_s30  ;;  %v354_v3 = vsel %vm327_vm0, %v351_v63, %v353_v10  ;;  %v893_v54 = vsel %vm890_vm10, %v878_v31, %v2398_v19  ;;  %v638_v19 = vsel %vm615_vm5, %v635_v12, %v637_v41  ;;  %v425_v11 = vrot.slane %v2518_v50, 3 }
  0xc8   : > { %1781 = vmatmul.mubr.msk.f32.vlgmr.msra.gmra.mrb[0].mxu0 %vm1000_vm4, %v967_v49  ;;  %v568_v59 = vsel %vm3070_vm3, %v565_v60, %v567_v30  ;;  %v908_v4 = vsel %vm905_vm11, %v893_v54, %v2444_v55  ;;  %v709_v12 = vrot.slane %v2377_v6, 7  ;;  %vm3071_vm3 = vcmask 1043456  }
  0xc9   : > { %v2513_v26 = vpop.permute.xlu1 %437  ;;  %v2515_v51 = vpop.permute.xlu0 %367  ;;  %v923_v61 = vsel %vm920_vm12, %v908_v4, %v650_v27  ;;  %v849_v27 = vsel %vm845_vm7, %v2022_v17, %v2353_v56  ;;  %v426_v17 = vsel %vm3069_vm2, %v423_v40, %v425_v11 }
  0xca   : > { %v710_v40 = vsel %vm687_vm6, %v707_v1, %v709_v12 }
  0xcb   : > { %521 = vrot.lane.b32.xlu1 %v494_v35, %s1933_s28  ;;  %451 = vrot.lane.b32.xlu0 %v424_v36, %s1932_s27 }
  0xcd   : > { %v722_v24 = vpop.permute.xlu1 %721  ;;  %v652_v42 = vpop.permute.xlu0 %651 }
  0xce   : > { %v938_v63 = vsel %vm935_vm13, %v923_v61, %v722_v24 }
  0xcf   : > { %775 = vrot.lane.b32.xlu1 %v2279_v16, %s1937_s6  ;;  %735 = vrot.lane.b32.xlu0 %v708_v8, %s1936_s14  ;;  %v864_v8 = vsel %vm860_vm8, %v849_v27, %v2374_v5  ;;  %v639_v5 = vrot.slane %v2403_v21, 6 }
  0xd0   : > { %v879_v24 = vsel %vm875_vm9, %v864_v8, %v2400_v20 }
  0xd1   : > { %v2542_v7 = vpop.permute.xlu1 %509  ;;  %v2544_v9 = vpop.permute.xlu0 %439 }
  0xd3   : > { %523 = vrot.lane.b32.xlu1 %v496_v58, %s1933_s28  ;;  %308 = vrot.lane.b32.xlu0 %v2539_v46, %s1931_s26 }
  0xd5   : > { %v764_v2 = vpop.permute.xlu1 %763  ;;  %v724_v32 = vpop.permute.xlu0 %723 }
  0xd6   : > { %v953_v49 = vsel %vm950_vm14, %v938_v63, %v764_v2 }
  0xd7   : > { %777 = vrot.lane.b32.xlu1 %v2299_v29, %s1937_s6  ;;  %593 = vrot.lane.b32.xlu0 %v566_v53, %s1934_s29 }
  0xd9   : > { %v2557_v14 = vpop.permute.xlu1 %511  ;;  %v2559_v22 = vpop.permute.xlu0 %296 }
  0xdb   : > { %310 = vrot.lane.b32.xlu1 %v2527_v38, %s1931_s26  ;;  %819 = vrot.lane.b32.xlu0 %v2314_v33, %s1938_s16  ;;  %v2584_v33 = vld [vmem:[%s1993_s24 + $0x70] sm:$0xff] }
  0xdc   : > { %v355_v48 = vrot.slane %v2584_v33, 2  ;;  %v427_v34 = vrot.slane %v2584_v33, 3  ;;  %v499_v4 = vrot.slane %v2584_v33, 4 }
  0xdd   : > { %v766_v47 = vpop.permute.xlu1 %765  ;;  %v2581_v23 = vpop.permute.xlu0 %581 }
  0xde   : > { %v356_v56 = vsel %vm327_vm0, %v353_v10, %v355_v48  ;;  %v497_v10 = vrot.slane %v2518_v50, 4 }
  0xdf   : > { %595 = vrot.lane.b32.xlu1 %v568_v59, %s1934_s29  ;;  %381 = vrot.lane.b32.xlu0 %v354_v3, %s1930_s25  ;;  %v711_v59 = vrot.slane %v2403_v21, 7 }
  0xe0   : > { %v498_v1 = vsel %vm3071_vm3, %v495_v57, %v497_v10  ;;  %vm3072_vm3 = vcmask 1042432  }
  0xe1   : > { %v2598_v35 = vpop.permute.xlu1 %298  ;;  %v808_v55 = vpop.permute.xlu0 %807  ;;  %v712_v54 = vsel %vm687_vm6, %v709_v12, %v711_v59  ;;  %v643_v12 = vrot.slane %v2584_v33, 6 }
  0xe2   : > { %v968_v36 = vsel %vm965_vm15, %v953_v49, %v808_v55  ;;  %v641_v49 = vrot.slane %v2518_v50, 6  ;;  %v571_v55 = vrot.slane %v2584_v33, 5 }
  0xe3   : > { %821 = vrot.lane.b32.xlu1 %v2395_v13, %s1938_s16  ;;  %665 = vrot.lane.b32.xlu0 %v638_v19, %s1935_s30  ;;  %v894_v13 = vsel %vm890_vm10, %v879_v24, %v2423_v43  ;;  %v640_v43 = vsel %vm615_vm5, %v637_v41, %v639_v5 }
  0xe4   : > { %1783 = vmatprep.mubr.msk.f32.mxu0 %vm1000_vm4, %v968_v36  ;;  %v909_v20 = vsel %vm905_vm11, %v894_v13, %v2482_v18  ;;  %v644_v13 = vsel %vm615_vm5, %v641_v49, %v643_v12 }
  0xe5   : > { %v2620_v58 = vpop.permute.xlu1 %583  ;;  %v2622_v60 = vpop.permute.xlu0 %369  ;;  %v924_v53 = vsel %vm920_vm12, %v909_v20, %v652_v42  ;;  %v713_v20 = vrot.slane %v2518_v50, 7 }
  0xe6   : > { %v939_v2 = vsel %vm935_vm13, %v924_v53, %v724_v32  ;;  %v428_v32 = vsel %vm3069_vm2, %v425_v11, %v427_v34  ;;  %vm3073_vm2 = vcmask 1043456   ;;  %v715_v53 = vrot.slane %v2584_v33, 7 }
  0xe7   : > { %453 = vrot.lane.b32.xlu1 %v426_v17, %s1932_s27  ;;  %383 = vrot.lane.b32.xlu0 %v356_v56, %s1930_s25  ;;  %v954_v18 = vsel %vm950_vm14, %v939_v2, %v766_v47  ;;  %v569_v47 = vrot.slane %v2518_v50, 5  ;;  %v500_v19 = vsel %vm3073_vm2, %v497_v10, %v499_v4  ;;  %vm3074_vm2 = vmmov %vm3072_vm3  ;;  %v850_v56 = vsel %vm845_vm7, %v2042_v28, %v2425_v44 }
  0xe8   : > { %v714_v10 = vsel %vm687_vm6, %v711_v59, %v713_v20 }
  0xe9   : > { %v810_v37 = vpop.permute.xlu1 %809  ;;  %v654_v42 = vpop.permute.xlu0 %653  ;;  %v570_v63 = vsel %vm3072_vm3, %v567_v30, %v569_v47  ;;  %v642_v30 = vsel %vm615_vm5, %v639_v5, %v641_v49  ;;  %v572_v8 = vsel %vm3074_vm2, %v569_v47, %v571_v55  ;;  %vm1195_vm5 = vcmask 31744  }
  0xea   : > { %v969_v31 = vsel %vm965_vm15, %v954_v18, %v810_v37  ;;  %vm1416_vm2 = vcmask 64512  }
  0xeb   : > { %737 = vrot.lane.b32.xlu1 %v710_v40, %s1936_s14  ;;  %667 = vrot.lane.b32.xlu0 %v640_v43, %s1935_s30  ;;  %v716_v43 = vsel %vm687_vm6, %v713_v20, %v715_v53  ;;  %vm1941_vm6 = vmmov 0  }
  0xec   : > { %1784 = vmatmul.mubr.msk.f32.gmra.mrb[2].mxu0 %vm1000_vm4, %v969_v31  ;;  %v801_v31 = vrot.slane %v2584_v33, 1 }
  0xed   : > { %v2646_v3 = vpop.permute.xlu1 %441  ;;  %v2648_v41 = vpop.permute.xlu0 %371 }
  0xee   : > { %v802_v59 = vsel %vm256_vm1, %v2527_v38, %v801_v31 }
  0xef   : > { %525 = vrot.lane.b32.xlu1 %v498_v1, %s1933_s28  ;;  %455 = vrot.lane.b32.xlu0 %v428_v32, %s1932_s27 }
  0xf1   : > { %v726_v61 = vpop.permute.xlu1 %725  ;;  %v656_v57 = vpop.permute.xlu0 %655 }
  0xf3   : > { %779 = vrot.lane.b32.xlu1 %v2377_v6, %s1937_s6  ;;  %739 = vrot.lane.b32.xlu0 %v712_v54, %s1936_s14 }
  0xf5   : > { %v2662_v11 = vpop.permute.xlu1 %513  ;;  %v2664_v48 = vpop.permute.xlu0 %443 }
  0xf7   : > { %597 = vrot.lane.b32.xlu1 %v570_v63, %s1934_s29  ;;  %527 = vrot.lane.b32.xlu0 %v500_v19, %s1933_s28 }
  0xf9   : > { %v768_v27 = vpop.permute.xlu1 %767  ;;  %v728_v36 = vpop.permute.xlu0 %727 }
  0xfb   : > { %823 = vrot.lane.b32.xlu1 %v2419_v39, %s1938_s16  ;;  %781 = vrot.lane.b32.xlu0 %v2403_v21, %s1937_s6  ;;  %v865_v39 = vsel %vm860_vm8, %v850_v56, %v2484_v25 }
  0xfc   : > { %v880_v5 = vsel %vm875_vm9, %v865_v39, %v2513_v26 }
  0xfd   : > { %v2677_v24 = vpop.permute.xlu1 %515  ;;  %v2679_v17 = vpop.permute.xlu0 %300  ;;  %v895_v40 = vsel %vm890_vm10, %v880_v5, %v2542_v7 }
  0xfe   : > { %v910_v25 = vsel %vm905_vm11, %v895_v40, %v2581_v23  ;;  %v851_v23 = vsel %vm845_vm7, %v2114_v62, %v2461_v0 }
  0xff   : > { %669 = vrot.lane.b32.xlu1 %v642_v30, %s1935_s30  ;;  %599 = vrot.lane.b32.xlu0 %v572_v8, %s1934_s29  ;;  %v925_v2 = vsel %vm920_vm12, %v910_v25, %v654_v42 }
 0x100   : > { %v940_v26 = vsel %vm935_vm13, %v925_v2, %v726_v61 }
 0x101   : > { %v770_v28 = vpop.permute.xlu1 %769  ;;  %v586_v44 = vpop.permute.xlu0 %585  ;;  %v955_v7 = vsel %vm950_vm14, %v940_v26, %v768_v27 }
 0x103   : > { %671 = vrot.lane.b32.xlu1 %v644_v13, %s1935_s30  ;;  %825 = vrot.lane.b32.xlu0 %v2539_v46, %s1938_s16  ;;  %v866_v46 = vsel %vm860_vm8, %v851_v23, %v2515_v51 }
 0x104   : > { %v881_v42 = vsel %vm875_vm9, %v866_v46, %v2544_v9 }
 0x105   : > { %v2705_v34 = vpop.permute.xlu1 %302  ;;  %v812_v18 = vpop.permute.xlu0 %811  ;;  %v896_v1 = vsel %vm890_vm10, %v881_v42, %v2557_v14 }
 0x106   : > { %v970_v37 = vsel %vm965_vm15, %v955_v7, %v812_v18  ;;  %v911_v51 = vsel %vm905_vm11, %v896_v1, %v2620_v58 }
 0x107   : > { %743 = vrot.lane.b32.xlu1 %v716_v43, %s1936_s14  ;;  %741 = vrot.lane.b32.xlu0 %v714_v10, %s1936_s14  ;;  %v926_v32 = vsel %vm920_vm12, %v911_v51, %v656_v57 }
 0x108   : > { %1786 = vmatprep.mubr.msk.f32.mxu0 %vm1000_vm4, %v970_v37  ;;  %v941_v9 = vsel %vm935_vm13, %v926_v32, %v728_v36  ;;  %v852_v36 = vsel %vm845_vm7, %v2148_v15, %v2559_v22 }
 0x109   : > { %v588_v62 = vpop.permute.xlu1 %587  ;;  %v2721_v0 = vpop.permute.xlu0 %373  ;;  %v956_v14 = vsel %vm950_vm14, %v941_v9, %v770_v28  ;;  %v867_v30 = vsel %vm860_vm8, %v852_v36, %v2622_v60  ;;  %v853_v60 = vsel %vm845_vm7, %v2217_v45, %v2598_v35 }
 0x10a   : > { %v882_v8 = vsel %vm875_vm9, %v867_v30, %v2646_v3 }
 0x10b   : > { %785 = vrot.lane.b32.xlu1 %v2584_v33, %s1937_s6  ;;  %783 = vrot.lane.b32.xlu0 %v2518_v50, %s1937_s6  ;;  %v897_v12 = vsel %vm890_vm10, %v882_v8, %v2662_v11  ;;  %v868_v11 = vsel %vm860_vm8, %v853_v60, %v2648_v41  ;;  %s1716_s6 = sshll.u32 %s3089_s21, 5 }
 0x10c   : > { %v912_v5 = vsel %vm905_vm11, %v897_v12, %v586_v44  ;;  %v883_v40 = vsel %vm875_vm9, %v868_v11, %v2664_v48  ;;  %s3046_s9 = scalar_lea.vmem %s3066_s5, %s1716_s6 }
 0x10d   : > { %v814_v54 = vpop.permute.xlu1 %813  ;;  %v658_v47 = vpop.permute.xlu0 %657  ;;  %v898_v28 = vsel %vm890_vm10, %v883_v40, %v2677_v24 }
 0x10e   : > { %v971_v4 = vsel %vm965_vm15, %v956_v14, %v814_v54  ;;  %v927_v13 = vsel %vm920_vm12, %v912_v5, %v658_v47  ;;  %v913_v2 = vsel %vm905_vm11, %v898_v28, %v588_v62  ;;  %v854_v62 = vsel %vm845_vm7, %v2233_v52, %v2679_v17 }
 0x10f   : > { %829 = vrot.lane.b32.xlu1 %v801_v31, %s1938_s16  ;;  %827 = vrot.lane.b32.xlu0 %v802_v59, %s1938_s16  ;;  %v869_v51 = vsel %vm860_vm8, %v854_v62, %v2721_v0  ;;  %v855_v52 = vsel %vm845_vm7, %v2279_v16, %v2705_v34 }
 0x110   : > { %1787 = vmatmul.mubr.msk.f32.gmra.mrb[4].mxu0 %vm1000_vm4, %v971_v4 }
 0x111   : > { %v446_v33 = vpop.permute.xlu1 %445  ;;  %v376_v58 = vpop.permute.xlu0 %375 }
 0x112   : > { %v884_v32 = vsel %vm875_vm9, %v869_v51, %v446_v33  ;;  %v870_v0 = vsel %vm860_vm8, %v855_v52, %v376_v58 }
 0x115   : > { %v730_v61 = vpop.permute.xlu1 %729  ;;  %v660_v57 = vpop.permute.xlu0 %659 }
 0x116   : > { %v942_v20 = vsel %vm935_vm13, %v927_v13, %v730_v61  ;;  %v928_v26 = vsel %vm920_vm12, %v913_v2, %v660_v57 }
 0x119   : > { %v518_v63 = vpop.permute.xlu1 %517  ;;  %v448_v19 = vpop.permute.xlu0 %447 }
 0x11a   : > { %v899_v9 = vsel %vm890_vm10, %v884_v32, %v518_v63  ;;  %v885_v33 = vsel %vm875_vm9, %v870_v0, %v448_v19 }
 0x11d   : > { %v772_v49 = vpop.permute.xlu1 %771  ;;  %v732_v38 = vpop.permute.xlu0 %731 }
 0x11e   : > { %v957_v53 = vsel %vm950_vm14, %v942_v20, %v772_v49  ;;  %v943_v45 = vsel %vm935_vm13, %v928_v26, %v732_v38 }
 0x121   : > { %v520_v55 = vpop.permute.xlu1 %519  ;;  %v2738_v27 = vpop.permute.xlu0 %304 }
 0x122   : > { %v900_v63 = vsel %vm890_vm10, %v885_v33, %v520_v55  ;;  %v856_v60 = vsel %vm845_vm7, %v2299_v29, %v2738_v27 }
 0x125   : > { %v774_v56 = vpop.permute.xlu1 %773  ;;  %v590_v39 = vpop.permute.xlu0 %589 }
 0x126   : > { %v958_v35 = vsel %vm950_vm14, %v943_v45, %v774_v56  ;;  %v914_v54 = vsel %vm905_vm11, %v899_v9, %v590_v39 }
 0x129   : > { %v2753_v15 = vpop.permute.xlu1 %306  ;;  %v816_v22 = vpop.permute.xlu0 %815 }
 0x12a   : > { %v972_v3 = vsel %vm965_vm15, %v957_v53, %v816_v22  ;;  %v857_v29 = vsel %vm845_vm7, %v2377_v6, %v2753_v15 }
 0x12b   : > { %1789 = vmatprep.mubr.msk.f32.mxu0 %vm1000_vm4, %v972_v3 }
 0x12d   : > { %v592_v44 = vpop.permute.xlu1 %591  ;;  %v378_v25 = vpop.permute.xlu0 %377 }
 0x12e   : > { %v915_v30 = vsel %vm905_vm11, %v900_v63, %v592_v44  ;;  %v871_v3 = vsel %vm860_vm8, %v856_v60, %v378_v25 }
 0x131   : > { %v818_v43 = vpop.permute.xlu1 %817  ;;  %v662_v41 = vpop.permute.xlu0 %661 }
 0x132   : > { %v973_v10 = vsel %vm965_vm15, %v958_v35, %v818_v43  ;;  %v929_v47 = vsel %vm920_vm12, %v914_v54, %v662_v41 }
 0x133   : > { %1790 = vmatmul.mubr.msk.f32.gmra.mrb[6].mxu0 %vm1000_vm4, %v973_v10 }
 0x135   : > { %v450_v48 = vpop.permute.xlu1 %449  ;;  %v380_v7 = vpop.permute.xlu0 %379 }
 0x136   : > { %v886_v11 = vsel %vm875_vm9, %v871_v3, %v450_v48  ;;  %v872_v25 = vsel %vm860_vm8, %v857_v29, %v380_v7 }
 0x139   : > { %v734_v18 = vpop.permute.xlu1 %733  ;;  %v664_v24 = vpop.permute.xlu0 %663 }
 0x13a   : > { %v944_v4 = vsel %vm935_vm13, %v929_v47, %v734_v18  ;;  %v930_v8 = vsel %vm920_vm12, %v915_v30, %v664_v24 }
 0x13d   : > { %v522_v23 = vpop.permute.xlu1 %521  ;;  %v452_v37 = vpop.permute.xlu0 %451 }
 0x13e   : > { %v901_v40 = vsel %vm890_vm10, %v886_v11, %v522_v23  ;;  %v887_v10 = vsel %vm875_vm9, %v872_v25, %v452_v37 }
 0x141   : > { %v776_v46 = vpop.permute.xlu1 %775  ;;  %v736_v42 = vpop.permute.xlu0 %735 }
 0x142   : > { %v959_v61 = vsel %vm950_vm14, %v944_v4, %v776_v46  ;;  %v945_v12 = vsel %vm935_vm13, %v930_v8, %v736_v42  ;;  %v2849_v8 = vld [vmem:[%s3063_s2] ss:$0 sm:$0xff] }
 0x145   : > { %v524_v31 = vpop.permute.xlu1 %523  ;;  %v2772_v1 = vpop.permute.xlu0 %308 }
 0x146   : > { %v902_v48 = vsel %vm890_vm10, %v887_v10, %v524_v31  ;;  %v858_v31 = vsel %vm845_vm7, %v2403_v21, %v2772_v1  ;;  %v1940_v10 = vmov 0.0  }
 0x147   : > { %1807 = vmatprep.mubr.msk.f32.mxu1 %vm1941_vm6, %v1940_v10 }
 0x149   : > { %v778_v59 = vpop.permute.xlu1 %777  ;;  %v594_v14 = vpop.permute.xlu0 %593 }
 0x14a   : > { %v960_v16 = vsel %vm950_vm14, %v945_v12, %v778_v59  ;;  %v916_v2 = vsel %vm905_vm11, %v901_v40, %v594_v14 }
 0x14d   : > { %v311_v57 = vpop.permute.xlu1 %310  ;;  %v820_v49 = vpop.permute.xlu0 %819 }
 0x14e   : > { %v974_v17 = vsel %vm965_vm15, %v959_v61, %v820_v49  ;;  %v859_v32 = vsel %vm845_vm7, %v2518_v50, %v311_v57 }
 0x14f   : > { %1792 = vmatprep.mubr.msk.f32.mxu0 %vm1000_vm4, %v974_v17 }
 0x151   : > { %v596_v38 = vpop.permute.xlu1 %595  ;;  %v382_v36 = vpop.permute.xlu0 %381 }
 0x152   : > { %v917_v23 = vsel %vm905_vm11, %v902_v48, %v596_v38  ;;  %v873_v9 = vsel %vm860_vm8, %v858_v31, %v382_v36  ;;  %v1442_v48 = vld [vmem:[%s3064_s3 + $0x10] sm:$0xf] }
 0x155   : > { %v822_v34 = vpop.permute.xlu1 %821  ;;  %v666_v56 = vpop.permute.xlu0 %665 }
 0x156   : > { %v975_v58 = vsel %vm965_vm15, %v960_v16, %v822_v34  ;;  %v931_v26 = vsel %vm920_vm12, %v916_v2, %v666_v56 }
 0x157   : > { %1793 = vmatmul.mubr.msk.f32.gmra.mrb[8].mxu0 %vm1000_vm4, %v975_v58 }
 0x159   : > { %v454_v39 = vpop.permute.xlu1 %453  ;;  %v384_v19 = vpop.permute.xlu0 %383 }
 0x15a   : > { %v874_v59 = vsel %vm860_vm8, %v859_v32, %v384_v19  ;;  %v888_v14 = vsel %vm875_vm9, %v873_v9, %v454_v39 }
 0x15d   : > { %v738_v5 = vpop.permute.xlu1 %737  ;;  %v668_v55 = vpop.permute.xlu0 %667 }
 0x15e   : > { %v946_v45 = vsel %vm935_vm13, %v931_v26, %v738_v5  ;;  %v932_v46 = vsel %vm920_vm12, %v917_v23, %v668_v55 }
 0x161   : > { %v526_v13 = vpop.permute.xlu1 %525  ;;  %v456_v20 = vpop.permute.xlu0 %455 }
 0x162   : > { %v889_v54 = vsel %vm875_vm9, %v874_v59, %v456_v20  ;;  %v903_v47 = vsel %vm890_vm10, %v888_v14, %v526_v13  ;;  %vm3077_vm9 = vcmask 1044480  }
 0x163   : > { %vm3083_vm3 = vmmov %vm3077_vm9 }
 0x165   : > { %v780_v53 = vpop.permute.xlu1 %779  ;;  %v740_v22 = vpop.permute.xlu0 %739 }
 0x166   : > { %v961_v35 = vsel %vm950_vm14, %v946_v45, %v780_v53  ;;  %v947_v42 = vsel %vm935_vm13, %v932_v46, %v740_v22  ;;  %v1939_v45 = vmov 0.0|0.0  }
 0x167   : > { %1852 = vmatprep.subr.bf16.mxu1 %v1939_v45 }
 0x169   : > { %v598_v28 = vpop.permute.xlu1 %597  ;;  %v528_v44 = vpop.permute.xlu0 %527 }
 0x16a   : > { %v904_v4 = vsel %vm890_vm10, %v889_v54, %v528_v44  ;;  %v918_v52 = vsel %vm905_vm11, %v903_v47, %v598_v28  ;;  %v1440_v28 = vld [vmem:[%s3064_s3] sm:$0xff]  ;;  %v1441_v44 = vld [vmem:[%s3064_s3 + $0x8] sm:$0xff] }
 0x16b   : > { %v1853_v26 = vpack.c.bf16 %v1441_v44, %v1440_v28 }
 0x16d   : > { %v824_v43 = vpop.permute.xlu1 %823  ;;  %v782_v41 = vpop.permute.xlu0 %781  ;;  %1854 = vmatpush3.bf16.msra.mxu1 %v1853_v26 }
 0x16e   : > { %v976_v27 = vsel %vm965_vm15, %v961_v35, %v824_v43  ;;  %v962_v6 = vsel %vm950_vm14, %v947_v42, %v782_v41  ;;  %1805 = vmatprep.subr.mxu1 %v1940_v10 }
 0x16f   : > { %1795 = vmatprep.mubr.msk.f32.mxu0 %vm1000_vm4, %v976_v27 }
 0x171   : > { %v670_v18 = vpop.permute.xlu1 %669  ;;  %v600_v24 = vpop.permute.xlu0 %599 }
 0x172   : > { %v919_v21 = vsel %vm905_vm11, %v904_v4, %v600_v24  ;;  %v933_v50 = vsel %vm920_vm12, %v918_v52, %v670_v18  ;;  %vm3079_vm11 = vmmov %vm3077_vm9 }
 0x175   : > { %v672_v15 = vpop.permute.xlu1 %671  ;;  %v826_v62 = vpop.permute.xlu0 %825 }
 0x176   : > { %v977_v7 = vsel %vm965_vm15, %v962_v6, %v826_v62  ;;  %v934_v1 = vsel %vm920_vm12, %v919_v21, %v672_v15 }
 0x177   : > { %1796 = vmatmul.mubr.msk.f32.gmra.mrb[10].mxu0 %vm1000_vm4, %v977_v7 }
 0x179   : > { %v744_v51 = vpop.permute.xlu1 %743  ;;  %v742_v37 = vpop.permute.xlu0 %741 }
 0x17a   : > { %v949_v57 = vsel %vm935_vm13, %v934_v1, %v744_v51  ;;  %v948_v17 = vsel %vm935_vm13, %v933_v50, %v742_v37  ;;  %vm3081_vm13 = vmmov %vm3077_vm9 }
 0x17d   : > { %v786_v61 = vpop.permute.xlu1 %785  ;;  %v784_v49 = vpop.permute.xlu0 %783 }
 0x17e   : > { %v964_v0 = vsel %vm950_vm14, %v949_v57, %v786_v61  ;;  %v963_v33 = vsel %vm950_vm14, %v948_v17, %v784_v49  ;;  %vm1209_vm14 = vcmask 30720  }
 0x181   : > { %v830_v63 = vpop.permute.xlu1 %829  ;;  %v828_v38 = vpop.permute.xlu0 %827 }
 0x182   : > { %v979_v36 = vsel %vm965_vm15, %v964_v0, %v830_v63  ;;  %v978_v30 = vsel %vm965_vm15, %v963_v33, %v828_v38 }
 0x183   : > { %1798 = vmatprep.mubr.msk.f32.mxu0 %vm1000_vm4, %v978_v30 }
 0x184   : > { %1799 = vmatmul.mubr.msk.f32.gmra.mrb[12].mxu0 %vm1000_vm4, %v979_v36  ;;  %vm3075_vm4 = vcmask 1043456  }
 0x185   : > { %1806 = vmatpush3.msk.msra.mxu1 %vm3075_vm4, %v1442_v48  ;;  %vm3076_vm7 = vmmov %vm3075_vm4 }
 0x186   : > { %vm3078_vm10 = vmmov %vm3075_vm4 }
 0x187   : > { %vm3080_vm12 = vmmov %vm3075_vm4 }
 0x188   : > { %vm3082_vm15 = vmmov %vm3075_vm4  ;;  %vm1424_vm4 = vcmask 97280  }
 0x19b   : > { %v1782_v12 = vpop.f32.mrb[0].mxu0 }
 0x19c   : > { %v1118_v16 = vadd.f32 %v1782_v12, %v2849_v8  ;;  %v1112_v34 = vpop.f32.mrb[1].mxu0 }
 0x19d   : > { %v1113_v56 = vadd.f32 %v2849_v8, %v1112_v34 }
 0x19e   : > { %1880 = vtanh.f32 %v1118_v16 }
 0x19f   : > { %1882 = vtanh.f32 %v1113_v56 }
 0x1a8   : > { %v1881_v58 = vpop.eup %1880 }
 0x1a9   : > { %v1883_v39 = vpop.eup %1882  ;;  %1197 = vst.msk [vmem:[#allocation2 + $0x8] sm:$0xff] %vm1195_vm5, %v1881_v58 }
 0x1aa   : > { %1196 = vst.msk [vmem:[#allocation2] sm:$0xff] %vm1195_vm5, %v1883_v39 }
 0x1b1   : > { %v1211_v35 = vld [vmem:[#allocation2] ss:$2 sm:$0xff]  ;;  %v1225_v43 = vld [vmem:[#allocation2 + $0x1] ss:$2 sm:$0xff] }
 0x1b2   : > { %v1238_v25 = vmax.f32 %v1211_v35, %v1225_v43 }
 0x1bf   : > { %v1785_v19 = vpop.f32.mrb[2].mxu0 }
 0x1c0   : > { %v1128_v5 = vadd.f32 %v1785_v19, %v2849_v8  ;;  %v1122_v55 = vpop.f32.mrb[3].mxu0 }
 0x1c1   : > { %v1123_v13 = vadd.f32 %v2849_v8, %v1122_v55 }
 0x1c2   : > { %1884 = vtanh.f32 %v1128_v5 }
 0x1c3   : > { %1886 = vtanh.f32 %v1123_v13 }
 0x1cc   : > { %v1885_v20 = vpop.eup %1884 }
 0x1cd   : > { %v1887_v53 = vpop.eup %1886  ;;  %1199 = vst.msk [vmem:[#allocation2 + $0x18] sm:$0xff] %vm1195_vm5, %v1885_v20 }
 0x1ce   : > { %1198 = vst.msk [vmem:[#allocation2 + $0x10] sm:$0xff] %vm1195_vm5, %v1887_v53 }
 0x1d5   : > { %v1213_v41 = vld [vmem:[#allocation2 + $0x10] ss:$2 sm:$0xff]  ;;  %v1227_v29 = vld [vmem:[#allocation2 + $0x11] ss:$2 sm:$0xff] }
 0x1d6   : > { %v1246_v27 = vld [vmem:[#allocation2 + $0x2] ss:$2 sm:$0xff]  ;;  %v1239_v18 = vmax.f32 %v1213_v41, %v1227_v29 }
 0x1d7   : > { %v2876_v24 = vmax.f32 %v1238_v25, %v1246_v27 }
 0x1d9   : > { %v1307_v42 = vrot.slane %v2876_v24, 2  ;;  %v1273_v15 = vrot.slane %v2876_v24, 1  ;;  %v1375_v32 = vrot.slane %v2876_v24, 4  ;;  %v1341_v9 = vrot.slane %v2876_v24, 3 }
 0x1e3   : > { %v1788_v22 = vpop.f32.mrb[4].mxu0 }
 0x1e4   : > { %v1138_v60 = vadd.f32 %v1788_v22, %v2849_v8  ;;  %v1132_v3 = vpop.f32.mrb[5].mxu0 }
 0x1e5   : > { %v1133_v11 = vadd.f32 %v2849_v8, %v1132_v3 }
 0x1e6   : > { %1888 = vtanh.f32 %v1138_v60 }
 0x1e7   : > { %1890 = vtanh.f32 %v1133_v11 }
 0x1f0   : > { %v1889_v40 = vpop.eup %1888 }
 0x1f1   : > { %v1891_v2 = vpop.eup %1890  ;;  %1201 = vst.msk [vmem:[#allocation2 + $0x28] sm:$0xff] %vm1195_vm5, %v1889_v40 }
 0x1f2   : > { %1200 = vst.msk [vmem:[#allocation2 + $0x20] sm:$0xff] %vm1195_vm5, %v1891_v2 }
 0x1f9   : > { %v1248_v23 = vld [vmem:[#allocation2 + $0x12] ss:$2 sm:$0xff]  ;;  %v1229_v50 = vld [vmem:[#allocation2 + $0x21] ss:$2 sm:$0xff] }
 0x1fa   : > { %v2878_v46 = vmax.f32 %v1239_v18, %v1248_v23  ;;  %v1215_v21 = vld [vmem:[#allocation2 + $0x20] ss:$2 sm:$0xff] }
 0x1fb   : > { %v1240_v1 = vmax.f32 %v1215_v21, %v1229_v50 }
 0x1fc   : > { %v1308_v6 = vrot.slane %v2878_v46, 2  ;;  %v1274_v62 = vrot.slane %v2878_v46, 1  ;;  %v1376_v37 = vrot.slane %v2878_v46, 4  ;;  %v1342_v31 = vrot.slane %v2878_v46, 3 }
 0x1fe   : > { %v1309_v7 = vsel %vm327_vm0, %v1307_v42, %v1308_v6  ;;  %v1275_v51 = vsel %vm256_vm1, %v1273_v15, %v1274_v62  ;;  %v1377_v59 = vsel %vm3076_vm7, %v1375_v32, %v1376_v37  ;;  %v1343_v14 = vsel %vm3077_vm9, %v1341_v9, %v1342_v31  ;;  %vm3084_vm9 = vmmov %vm3078_vm10 }
 0x1ff   : > { %1320 = vrot.lane.b32.xlu1 %v1309_v7, %s1942_s19  ;;  %1286 = vrot.lane.b32.xlu0 %v1275_v51, %s1943_s4  ;;  %vm1432_vm7 = vcmask 130048  }
 0x203   : > { %1388 = vrot.lane.b32.xlu1 %v1377_v59, %s1944_s22  ;;  %1354 = vrot.lane.b32.xlu0 %v1343_v14, %s1945_s23 }
 0x206   : > { %v1791_v54 = vpop.f32.mrb[6].mxu0 }
 0x207   : > { %v1148_v47 = vadd.f32 %v1791_v54, %v2849_v8  ;;  %v1142_v4 = vpop.f32.mrb[7].mxu0 }
 0x208   : > { %v1143_v61 = vadd.f32 %v2849_v8, %v1142_v4 }
 0x209   : > { %1892 = vtanh.f32 %v1148_v47 }
 0x20a   : > { %1894 = vtanh.f32 %v1143_v61 }
 0x213   : > { %v1893_v49 = vpop.eup %1892 }
 0x214   : > { %v1895_v52 = vpop.eup %1894  ;;  %1203 = vst.msk [vmem:[#allocation2 + $0x38] sm:$0xff] %vm1195_vm5, %v1893_v49 }
 0x215   : > { %1202 = vst.msk [vmem:[#allocation2 + $0x30] sm:$0xff] %vm1195_vm5, %v1895_v52 }
 0x21c   : > { %v1250_v57 = vld [vmem:[#allocation2 + $0x22] ss:$2 sm:$0xff]  ;;  %v1231_v13 = vld [vmem:[#allocation2 + $0x31] ss:$2 sm:$0xff] }
 0x21d   : > { %v2900_v17 = vmax.f32 %v1240_v1, %v1250_v57  ;;  %v1217_v55 = vld [vmem:[#allocation2 + $0x30] ss:$2 sm:$0xff] }
 0x21e   : > { %v1241_v20 = vmax.f32 %v1217_v55, %v1231_v13 }
 0x21f   : > { %v1310_v0 = vrot.slane %v2900_v17, 2  ;;  %v1276_v33 = vrot.slane %v2900_v17, 1  ;;  %v1378_v36 = vrot.slane %v2900_v17, 4  ;;  %v1344_v30 = vrot.slane %v2900_v17, 3 }
 0x221   : > { %v1311_v63 = vsel %vm327_vm0, %v1308_v6, %v1310_v0  ;;  %v1277_v38 = vsel %vm256_vm1, %v1274_v62, %v1276_v33  ;;  %v1379_v12 = vsel %vm3078_vm10, %v1376_v37, %v1378_v36  ;;  %v1345_v16 = vsel %vm3079_vm11, %v1342_v31, %v1344_v30  ;;  %vm3085_vm10 = vmmov %vm3083_vm3 }
 0x222   : > { %1322 = vrot.lane.b32.xlu1 %v1311_v63, %s1942_s19  ;;  %1288 = vrot.lane.b32.xlu0 %v1277_v38, %s1943_s4  ;;  %vm3086_vm11 = vmmov %vm3084_vm9 }
 0x226   : > { %1390 = vrot.lane.b32.xlu1 %v1379_v12, %s1944_s22  ;;  %1356 = vrot.lane.b32.xlu0 %v1345_v16, %s1945_s23 }
 0x22a   : > { %v1794_v34 = vpop.f32.mrb[8].mxu0 }
 0x22b   : > { %v1158_v56 = vadd.f32 %v1794_v34, %v2849_v8  ;;  %v1152_v58 = vpop.f32.mrb[9].mxu0 }
 0x22c   : > { %v1153_v39 = vadd.f32 %v2849_v8, %v1152_v58 }
 0x22d   : > { %1896 = vtanh.f32 %v1158_v56 }
 0x22e   : > { %1898 = vtanh.f32 %v1153_v39 }
 0x237   : > { %v1897_v19 = vpop.eup %1896 }
 0x238   : > { %v1899_v5 = vpop.eup %1898  ;;  %1205 = vst.msk [vmem:[#allocation2 + $0x48] sm:$0xff] %vm1195_vm5, %v1897_v19 }
 0x239   : > { %1204 = vst.msk [vmem:[#allocation2 + $0x40] sm:$0xff] %vm1195_vm5, %v1899_v5 }
 0x240   : > { %v1252_v53 = vld [vmem:[#allocation2 + $0x32] ss:$2 sm:$0xff]  ;;  %v1233_v6 = vld [vmem:[#allocation2 + $0x41] ss:$2 sm:$0xff] }
 0x241   : > { %v2918_v22 = vmax.f32 %v1241_v20, %v1252_v53  ;;  %v1219_v42 = vld [vmem:[#allocation2 + $0x40] ss:$2 sm:$0xff] }
 0x242   : > { %v1242_v15 = vmax.f32 %v1219_v42, %v1233_v6 }
 0x243   : > { %v1312_v60 = vrot.slane %v2918_v22, 2  ;;  %v1278_v3 = vrot.slane %v2918_v22, 1  ;;  %v1380_v28 = vrot.slane %v2918_v22, 4  ;;  %v1346_v44 = vrot.slane %v2918_v22, 3 }
 0x245   : > { %v1313_v11 = vsel %vm327_vm0, %v1310_v0, %v1312_v60  ;;  %v1279_v40 = vsel %vm256_vm1, %v1276_v33, %v1278_v3  ;;  %v1381_v2 = vsel %vm3080_vm12, %v1378_v36, %v1380_v28  ;;  %v1347_v26 = vsel %vm3081_vm13, %v1344_v30, %v1346_v44  ;;  %vm3087_vm12 = vmmov %vm3083_vm3 }
 0x246   : > { %1324 = vrot.lane.b32.xlu1 %v1313_v11, %s1942_s19  ;;  %1290 = vrot.lane.b32.xlu0 %v1279_v40, %s1943_s4 }
 0x24a   : > { %1392 = vrot.lane.b32.xlu1 %v1381_v2, %s1944_s22  ;;  %1358 = vrot.lane.b32.xlu0 %v1347_v26, %s1945_s23  ;;  %v1797_v45 = vpop.f32.mrb[10].mxu0 }
 0x24b   : > { %v1168_v35 = vadd.f32 %v1797_v45, %v2849_v8  ;;  %v1162_v43 = vpop.f32.mrb[11].mxu0 }
 0x24c   : > { %v1163_v41 = vadd.f32 %v2849_v8, %v1162_v43 }
 0x24d   : > { %1900 = vtanh.f32 %v1168_v35 }
 0x24e   : > { %1902 = vtanh.f32 %v1163_v41 }
 0x257   : > { %v1901_v29 = vpop.eup %1900  ;;  %v1800_v27 = vpop.f32.mrb[12].mxu0 }
 0x258   : > { %v1903_v25 = vpop.eup %1902  ;;  %1207 = vst.msk [vmem:[#allocation2 + $0x58] sm:$0xff] %vm1195_vm5, %v1901_v29  ;;  %v1178_v48 = vadd.f32 %v1800_v27, %v2849_v8  ;;  %v1172_v18 = vpop.f32.mrb[13].mxu0 }
 0x259   : > { %1206 = vst.msk [vmem:[#allocation2 + $0x50] sm:$0xff] %vm1195_vm5, %v1903_v25  ;;  %v1173_v23 = vadd.f32 %v2849_v8, %v1172_v18 }
 0x25a   : > { %1904 = vtanh.f32 %v1178_v48 }
 0x25b   : > { %1906 = vtanh.f32 %v1173_v23 }
 0x260   : > { %v1254_v62 = vld [vmem:[#allocation2 + $0x42] ss:$2 sm:$0xff]  ;;  %v1235_v61 = vld [vmem:[#allocation2 + $0x51] ss:$2 sm:$0xff] }
 0x261   : > { %v2938_v7 = vmax.f32 %v1242_v15, %v1254_v62  ;;  %v1221_v4 = vld [vmem:[#allocation2 + $0x50] ss:$2 sm:$0xff] }
 0x262   : > { %v1243_v49 = vmax.f32 %v1221_v4, %v1235_v61 }
 0x263   : > { %v1314_v51 = vrot.slane %v2938_v7, 2  ;;  %v1280_v37 = vrot.slane %v2938_v7, 1  ;;  %v1382_v59 = vrot.slane %v2938_v7, 4  ;;  %v1348_v14 = vrot.slane %v2938_v7, 3 }
 0x264   : > { %v1905_v31 = vpop.eup %1904 }
 0x265   : > { %v1907_v32 = vpop.eup %1906  ;;  %1210 = vst.msk [vmem:[#allocation2 + $0x68] sm:$0x7f] %vm1209_vm14, %v1905_v31  ;;  %v1315_v9 = vsel %vm327_vm0, %v1312_v60, %v1314_v51  ;;  %v1281_v8 = vsel %vm256_vm1, %v1278_v3, %v1280_v37  ;;  %v1383_v54 = vsel %vm3082_vm15, %v1380_v28, %v1382_v59  ;;  %v1349_v47 = vsel %vm3083_vm3, %v1346_v44, %v1348_v14 }
 0x266   : > { %1208 = vst.msk [vmem:[#allocation2 + $0x60] sm:$0xff] %vm1195_vm5, %v1907_v32  ;;  %1326 = vrot.lane.b32.xlu1 %v1315_v9, %s1942_s19  ;;  %1292 = vrot.lane.b32.xlu0 %v1281_v8, %s1943_s4 }
 0x26a   : > { %1394 = vrot.lane.b32.xlu1 %v1383_v54, %s1944_s22  ;;  %1360 = vrot.lane.b32.xlu0 %v1349_v47, %s1945_s23 }
 0x26d   : > { %v1256_v52 = vld [vmem:[#allocation2 + $0x52] ss:$2 sm:$0xff]  ;;  %v1237_v1 = vld [vmem:[#allocation2 + $0x61] ss:$2 sm:$0x7f] }
 0x26e   : > { %v2953_v21 = vmax.f32 %v1243_v49, %v1256_v52  ;;  %v1223_v50 = vld [vmem:[#allocation2 + $0x60] ss:$2 sm:$0x7f] }
 0x26f   : > { %v1244_v36 = vmax.f32 %v1223_v50, %v1237_v1  ;;  %v1258_v56 = vld [vmem:[#allocation2 + $0x62] ss:$2 sm:$0x7f] }
 0x270   : > { %v1316_v57 = vrot.slane %v2953_v21, 2  ;;  %v1282_v0 = vrot.slane %v2953_v21, 1  ;;  %v1384_v38 = vrot.slane %v2953_v21, 4  ;;  %v1350_v34 = vrot.slane %v2953_v21, 3 }
 0x271   : > { %v1321_v33 = vpop.permute.xlu1 %1320  ;;  %v1287_v63 = vpop.permute.xlu0 %1286  ;;  %v2966_v5 = vmax.f32 %v1244_v36, %v1258_v56 }
 0x272   : > { %v1409_v30 = vsel %vm1195_vm5, %v2876_v24, %v1287_v63  ;;  %v1317_v12 = vsel %vm327_vm0, %v1314_v51, %v1316_v57  ;;  %v1283_v16 = vsel %vm256_vm1, %v1280_v37, %v1282_v0  ;;  %v1385_v55 = vsel %vm3084_vm9, %v1382_v59, %v1384_v38 }
 0x273   : > { %1328 = vrot.lane.b32.xlu1 %v1317_v12, %s1942_s19  ;;  %1294 = vrot.lane.b32.xlu0 %v1283_v16, %s1943_s4  ;;  %v1417_v39 = vsel %vm1416_vm2, %v1409_v30, %v1321_v33  ;;  %v1351_v13 = vsel %vm3085_vm10, %v1348_v14, %v1350_v34  ;;  %v1318_v53 = vrot.slane %v2966_v5, 2  ;;  %v1284_v60 = vrot.slane %v2966_v5, 1 }
 0x274   : > { %v1386_v40 = vrot.slane %v2966_v5, 4  ;;  %v1352_v28 = vrot.slane %v2966_v5, 3 }
 0x275   : > { %v1389_v58 = vpop.permute.xlu1 %1388  ;;  %v1355_v19 = vpop.permute.xlu0 %1354  ;;  %v1319_v3 = vsel %vm327_vm0, %v1316_v57, %v1318_v53  ;;  %v1285_v11 = vsel %vm256_vm1, %v1282_v0, %v1284_v60  ;;  %vm1581_vm0 = vcmask 7168   ;;  %vm1588_vm1 = vcmask 2048  }
 0x276   : > { %v1425_v24 = vsel %vm1424_vm4, %v1417_v39, %v1355_v19  ;;  %v1387_v44 = vsel %vm3086_vm11, %v1384_v38, %v1386_v40  ;;  %v1353_v2 = vsel %vm3087_vm12, %v1350_v34, %v1352_v28  ;;  %v1705_v39 = vld [vmem:[#allocation4] ss:$0 sm:$0xff] }
 0x277   : > { %1396 = vrot.lane.b32.xlu1 %v1385_v55, %s1944_s22  ;;  %1362 = vrot.lane.b32.xlu0 %v1351_v13, %s1945_s23  ;;  %v1433_v20 = vsel %vm1432_vm7, %v1425_v24, %v1389_v58 }
 0x278   : > { %1808 = vmatmul.mubr.msk.f32.vlgmr.msra.gmra.mrb[0].mxu1 %vm860_vm8, %v1433_v20 }
 0x279   : > { %1810 = vmatprep.mubr.msk.f32.mxu1 %vm1941_vm6, %v1940_v10 }
 0x27b   : > { %1332 = vrot.lane.b32.xlu1 %v1318_v53, %s1942_s19  ;;  %1298 = vrot.lane.b32.xlu0 %v1284_v60, %s1943_s4 }
 0x27f   : > { %1330 = vrot.lane.b32.xlu1 %v1319_v3, %s1942_s19  ;;  %1296 = vrot.lane.b32.xlu0 %v1285_v11, %s1943_s4 }
 0x283   : > { %1398 = vrot.lane.b32.xlu1 %v1387_v44, %s1944_s22  ;;  %1364 = vrot.lane.b32.xlu0 %v1353_v2, %s1945_s23 }
 0x287   : > { %1400 = vrot.lane.b32.xlu1 %v1386_v40, %s1944_s22  ;;  %1366 = vrot.lane.b32.xlu0 %v1352_v28, %s1945_s23 }
 0x294   : > { %v1323_v26 = vpop.permute.xlu1 %1322  ;;  %v1289_v45 = vpop.permute.xlu0 %1288 }
 0x295   : > { %v1410_v35 = vsel %vm1195_vm5, %v2878_v46, %v1289_v45 }
 0x296   : > { %v1418_v41 = vsel %vm1416_vm2, %v1410_v35, %v1323_v26 }
 0x298   : > { %v1391_v43 = vpop.permute.xlu1 %1390  ;;  %v1357_v29 = vpop.permute.xlu0 %1356 }
 0x299   : > { %v1426_v27 = vsel %vm1424_vm4, %v1418_v41, %v1357_v29 }
 0x29a   : > { %v1434_v25 = vsel %vm1432_vm7, %v1426_v27, %v1391_v43 }
 0x29b   : > { %1811 = vmatmul.mubr.msk.f32.gmra.mrb[2].mxu1 %vm860_vm8, %v1434_v25 }
 0x29c   : > { %1813 = vmatprep.mubr.msk.f32.mxu1 %vm1941_vm6, %v1940_v10 }
 0x2b8   : > { %v1325_v48 = vpop.permute.xlu1 %1324  ;;  %v1291_v18 = vpop.permute.xlu0 %1290 }
 0x2b9   : > { %v1411_v23 = vsel %vm1195_vm5, %v2900_v17, %v1291_v18 }
 0x2ba   : > { %v1419_v46 = vsel %vm1416_vm2, %v1411_v23, %v1325_v48 }
 0x2bc   : > { %v1393_v42 = vpop.permute.xlu1 %1392  ;;  %v1359_v6 = vpop.permute.xlu0 %1358 }
 0x2bd   : > { %v1427_v15 = vsel %vm1424_vm4, %v1419_v46, %v1359_v6 }
 0x2be   : > { %v1435_v62 = vsel %vm1432_vm7, %v1427_v15, %v1393_v42 }
 0x2bf   : > { %1814 = vmatmul.mubr.msk.f32.gmra.mrb[4].mxu1 %vm860_vm8, %v1435_v62 }
 0x2c0   : > { %1816 = vmatprep.mubr.msk.f32.mxu1 %vm1941_vm6, %v1940_v10 }
 0x2d8   : > { %v1327_v51 = vpop.permute.xlu1 %1326  ;;  %v1293_v37 = vpop.permute.xlu0 %1292 }
 0x2d9   : > { %v1412_v31 = vsel %vm1195_vm5, %v2918_v22, %v1293_v37 }
 0x2da   : > { %v1420_v17 = vsel %vm1416_vm2, %v1412_v31, %v1327_v51 }
 0x2dc   : > { %v1395_v32 = vpop.permute.xlu1 %1394  ;;  %v1361_v9 = vpop.permute.xlu0 %1360 }
 0x2dd   : > { %v1428_v8 = vsel %vm1424_vm4, %v1420_v17, %v1361_v9 }
 0x2de   : > { %v1436_v59 = vsel %vm1432_vm7, %v1428_v8, %v1395_v32 }
 0x2df   : > { %1817 = vmatmul.mubr.msk.f32.gmra.mrb[6].mxu1 %vm860_vm8, %v1436_v59 }
 0x2e0   : > { %1819 = vmatprep.mubr.msk.f32.mxu1 %vm1941_vm6, %v1940_v10 }
 0x2e5   : > { %v1329_v14 = vpop.permute.xlu1 %1328  ;;  %v1295_v54 = vpop.permute.xlu0 %1294 }
 0x2e6   : > { %v1413_v47 = vsel %vm1195_vm5, %v2938_v7, %v1295_v54 }
 0x2e7   : > { %v1421_v22 = vsel %vm1416_vm2, %v1413_v47, %v1329_v14 }
 0x2e9   : > { %v1397_v4 = vpop.permute.xlu1 %1396  ;;  %v1363_v61 = vpop.permute.xlu0 %1362 }
 0x2ea   : > { %v1429_v49 = vsel %vm1424_vm4, %v1421_v22, %v1363_v61 }
 0x2eb   : > { %v1437_v52 = vsel %vm1432_vm7, %v1429_v49, %v1397_v4 }
 0x2ec   : > { %1820 = vmatmul.mubr.msk.f32.gmra.mrb[8].mxu1 %vm860_vm8, %v1437_v52 }
 0x2ed   : > { %v1333_v50 = vpop.permute.xlu1 %1332  ;;  %v1299_v1 = vpop.permute.xlu0 %1298  ;;  %1822 = vmatprep.mubr.msk.f32.mxu1 %vm1941_vm6, %v1940_v10 }
 0x2ee   : > { %v1415_v36 = vsel %vm1195_vm5, %v2966_v5, %v1299_v1 }
 0x2ef   : > { %v1423_v34 = vsel %vm1416_vm2, %v1415_v36, %v1333_v50 }
 0x2f1   : > { %v1331_v57 = vpop.permute.xlu1 %1330  ;;  %v1297_v0 = vpop.permute.xlu0 %1296 }
 0x2f2   : > { %v1414_v7 = vsel %vm1195_vm5, %v2953_v21, %v1297_v0 }
 0x2f3   : > { %v1422_v63 = vsel %vm1416_vm2, %v1414_v7, %v1331_v57 }
 0x2f5   : > { %v1399_v33 = vpop.permute.xlu1 %1398  ;;  %v1365_v38 = vpop.permute.xlu0 %1364 }
 0x2f6   : > { %v1430_v30 = vsel %vm1424_vm4, %v1422_v63, %v1365_v38 }
 0x2f7   : > { %v1438_v12 = vsel %vm1432_vm7, %v1430_v30, %v1399_v33 }
 0x2f8   : > { %1823 = vmatmul.mubr.msk.f32.gmra.mrb[10].mxu1 %vm860_vm8, %v1438_v12 }
 0x2f9   : > { %v1401_v16 = vpop.permute.xlu1 %1400  ;;  %v1367_v56 = vpop.permute.xlu0 %1366  ;;  %1825 = vmatprep.mubr.msk.f32.mxu1 %vm1941_vm6, %v1940_v10 }
 0x2fa   : > { %v1431_v21 = vsel %vm1424_vm4, %v1423_v34, %v1367_v56 }
 0x2fb   : > { %v1439_v58 = vsel %vm1432_vm7, %v1431_v21, %v1401_v16 }
 0x2fc   : > { %1826 = vmatmul.mubr.msk.f32.gmra.mrb[12].mxu1 %vm860_vm8, %v1439_v58  ;;  %vm1624_vm8 = vcmask 0  }
 0x34b   : > { %v1540_v19 = vpop.f32.mrb[0].mxu1 }
 0x34c   : > { %v1541_v5 = vadd.f32 %v1705_v39, %v1540_v19  ;;  %v1809_v24 = vpop.f32.mrb[1].mxu1 }
 0x34e   : > { %1908 = vtanh.f32 %v1541_v5 }
 0x358   : > { %v1909_v55 = vpop.eup %1908 }
 0x359   : > { %1582 = vst.msk [vmem:[#allocation3] sm:$0xff] %vm1581_vm0, %v1909_v55 }
 0x36e   : > { %v1545_v13 = vpop.f32.mrb[2].mxu1 }
 0x36f   : > { %v1546_v20 = vadd.f32 %v1705_v39, %v1545_v13  ;;  %v1812_v53 = vpop.f32.mrb[3].mxu1 }
 0x371   : > { %1910 = vtanh.f32 %v1546_v20 }
 0x37b   : > { %v1911_v10 = vpop.eup %1910 }
 0x37c   : > { %1583 = vst.msk [vmem:[#allocation3 + $0x8] sm:$0xff] %vm1581_vm0, %v1911_v10 }
 0x383   : > { %v1590_v28 = vld [vmem:[#allocation3] ss:$2 sm:$0xff]  ;;  %v1598_v44 = vld [vmem:[#allocation3 + $0x1] ss:$2 sm:$0xff] }
 0x384   : > { %v1605_v2 = vmax.f32 %v1590_v28, %v1598_v44 }
 0x392   : > { %v1550_v60 = vpop.f32.mrb[4].mxu1 }
 0x393   : > { %v1551_v3 = vadd.f32 %v1705_v39, %v1550_v60  ;;  %v1815_v11 = vpop.f32.mrb[5].mxu1 }
 0x395   : > { %1912 = vtanh.f32 %v1551_v3 }
 0x39f   : > { %v1913_v40 = vpop.eup %1912 }
 0x3a0   : > { %1584 = vst.msk [vmem:[#allocation3 + $0x10] sm:$0xff] %vm1581_vm0, %v1913_v40 }
 0x3a7   : > { %v1610_v26 = vld [vmem:[#allocation3 + $0x2] ss:$2 sm:$0xff] }
 0x3a8   : > { %v1617_v45 = vmax.f32 %v1605_v2, %v1610_v26 }
 0x3aa   : > { %1621 = vst.msk [vmem:[%s3046_s9] sm:$0xff] %vm1581_vm0, %v1617_v45 }
 0x3b2   : > { %v1555_v35 = vpop.f32.mrb[6].mxu1 }
 0x3b3   : > { %v1556_v43 = vadd.f32 %v1705_v39, %v1555_v35  ;;  %v1818_v41 = vpop.f32.mrb[7].mxu1 }
 0x3b5   : > { %1914 = vtanh.f32 %v1556_v43 }
 0x3bf   : > { %v1915_v29 = vpop.eup %1914  ;;  %v1560_v27 = vpop.f32.mrb[8].mxu1 }
 0x3c0   : > { %1585 = vst.msk [vmem:[#allocation3 + $0x18] sm:$0xff] %vm1581_vm0, %v1915_v29  ;;  %v1561_v25 = vadd.f32 %v1705_v39, %v1560_v27  ;;  %v1821_v48 = vpop.f32.mrb[9].mxu1 }
 0x3c2   : > { %1916 = vtanh.f32 %v1561_v25 }
 0x3c7   : > { %v1592_v15 = vld [vmem:[#allocation3 + $0x10] ss:$2 sm:$0xff]  ;;  %v1600_v62 = vld [vmem:[#allocation3 + $0x11] ss:$2 sm:$0xff] }
 0x3c8   : > { %v1606_v31 = vmax.f32 %v1592_v15, %v1600_v62 }
 0x3cb   : > { %v1565_v18 = vpop.f32.mrb[10].mxu1 }
 0x3cc   : > { %v1917_v23 = vpop.eup %1916  ;;  %v1566_v42 = vadd.f32 %v1705_v39, %v1565_v18  ;;  %v1824_v46 = vpop.f32.mrb[11].mxu1 }
 0x3cd   : > { %1586 = vst.msk [vmem:[#allocation3 + $0x20] sm:$0xff] %vm1581_vm0, %v1917_v23 }
 0x3ce   : > { %1918 = vtanh.f32 %v1566_v42 }
 0x3cf   : > { %v1570_v6 = vpop.f32.mrb[12].mxu1 }
 0x3d0   : > { %v1571_v51 = vadd.f32 %v1705_v39, %v1570_v6  ;;  %v1827_v37 = vpop.f32.mrb[13].mxu1 }
 0x3d2   : > { %1920 = vtanh.f32 %v1571_v51 }
 0x3d4   : > { %v1612_v32 = vld [vmem:[#allocation3 + $0x12] ss:$2 sm:$0xff] }
 0x3d5   : > { %v1618_v17 = vmax.f32 %v1606_v31, %v1612_v32 }
 0x3d7   : > { %1622 = vst.msk [vmem:[%s3046_s9 + $0x8] sm:$0xff] %vm1581_vm0, %v1618_v17 }
 0x3d8   : > { %v1919_v9 = vpop.eup %1918 }
 0x3d9   : > { %1587 = vst.msk [vmem:[#allocation3 + $0x28] sm:$0xff] %vm1581_vm0, %v1919_v9 }
 0x3dc   : > { %v1921_v8 = vpop.eup %1920 }
 0x3dd   : > { %1589 = vst.msk [vmem:[#allocation3 + $0x30] sm:$0x7] %vm1588_vm1, %v1921_v8 }
 0x3e0   : > { %v1594_v59 = vld [vmem:[#allocation3 + $0x20] ss:$2 sm:$0xff]  ;;  %v1602_v14 = vld [vmem:[#allocation3 + $0x21] ss:$2 sm:$0xff] }
 0x3e1   : > { %v1607_v54 = vmax.f32 %v1594_v59, %v1602_v14 }
 0x3e4   : > { %v1596_v47 = vld [vmem:[#allocation3 + $0x30] ss:$2 sm:$0x1]  ;;  %v1604_v4 = vld [vmem:[#allocation3 + $0x31] ss:$2 sm:$0x1] }
 0x3e5   : > { %v1608_v22 = vmax.f32 %v1596_v47, %v1604_v4  ;;  %v1614_v61 = vld [vmem:[#allocation3 + $0x22] ss:$2 sm:$0xff]  ;;  %v1616_v49 = vld [vmem:[#allocation3 + $0x32] ss:$2 sm:$0x1] }
 0x3e6   : > { %v1619_v52 = vmax.f32 %v1607_v54, %v1614_v61 }
 0x3e7   : > { %v1620_v50 = vmax.f32 %v1608_v22, %v1616_v49 }
 0x3e8   : > { %1623 = vst.msk [vmem:[%s3046_s9 + $0x10] sm:$0xff] %vm1581_vm0, %v1619_v52 }
 0x3e9   : > { %1625 = vst.msk [vmem:[%s3046_s9 + $0x18] sm:$0x1] %vm1624_vm8, %v1620_v50 }
 0x3ea PF: > { %s17_s20 = sadd.s32 1, %s1928_s20  }
 0x3eb   : > { %p14_p4 = scmp.ge.s32.totalorder %s17_s20, 6  }
 0x3ed   :  { %16 = sbr.rel (!%p14_p4) target bundleno = 3 (0x3), region = 101 }

// kernel: mycnn_forward.3
= control target key start
LH: loop header
LB: loop body
LE: loop exit
PB: predicated region body
PF: predicated region fallthrough
CT: control target
= control target key end

     0   :  { %v1201_v0 = vmov 0.0|0.0   ;;  %vm50_vm0 = vcmask 1040384   ;;  %vm1202_vm1 = vmmov 0   ;;  %v1203_v6 = vmov 0.0   ;;  %s1206_s20 = smov 16   ;;  %s1431_s1 = inlined_call_operand.vmem [shape: f32[25,64], index: 1, kind: input, shape index: {}]   ;;  %s1432_s0 = inlined_call_operand.vmem [shape: f32[4,25], index: 0, kind: input, shape index: {}]   ;;  %s1433_s3 = inlined_call_operand.vmem [shape: f32[1,64], index: 3, kind: input, shape index: {}]   ;;  %s1434_s4 = inlined_call_operand.vmem [shape: f32[32,64], index: 4, kind: input, shape index: {}]   ;;  %s1435_s2 = inlined_call_operand.vmem [shape: f32[16,64], index: 2, kind: input, shape index: {}]   ;;  %s1436_s5 = inlined_call_operand.vmem [shape: f32[1,64], index: 5, kind: input, shape index: {}]   ;;  %s1437_s6 = inlined_call_operand.vmem [shape: f32[16,1], index: 6, kind: input, shape index: {}]   ;;  %s1438_s7 = inlined_call_operand.<no memory space> [shape: f32[1,1], index: 7, kind: input, shape index: {}]   ;;  %s1439_s8 = inlined_call_operand.vmem [shape: f32[4,1], index: 8, kind: input, shape index: {}]   ;;  %s1440_s9 = inlined_call_operand.vmem [shape: f32[4,1], index: 9, kind: output, shape index: {}]  }
   0x1   :  { %1102 = vmatprep.subr.bf16.mxu0 %v1201_v0  ;;  %v35_v1 = vld [vmem:[%s1431_s1] sm:$0xff]  ;;  %v36_v2 = vld [vmem:[%s1431_s1 + $0x8] sm:$0xff]  ;;  %v37_v3 = vld [vmem:[%s1431_s1 + $0x10] sm:$0xff]  ;;  %1109 = vmatprep.subr.bf16.mxu1 %v1201_v0  ;;  %vm1204_vm2 = vmmov 1   ;;  %vm46_vm4 = vcmask 203776   ;;  %vm124_vm5 = vcmask 519168  }
   0x2   :  { %v1103_v4 = vpack.c.bf16 %v36_v2, %v35_v1  ;;  %v38_v5 = vld [vmem:[%s1431_s1 + $0x18] sm:$0x1]  ;;  %1027 = vmatprep.mubr.msk.f32.mxu0 %vm1202_vm1, %v1203_v6  ;;  %1038 = vmatprep.mubr.msk.f32.mxu1 %vm1202_vm1, %v1203_v6  ;;  %vm1107_vm3 = vmpackc.low %vm50_vm0, %vm1204_vm2  ;;  %v34_v8 = vld [vmem:[%s1432_s0] sm:$0xf]  ;;  %s1205_s0 = smov 96   ;;  %vm160_vm6 = vcmask 130048  }
   0x3   :  { %v1106_v7 = vpack.c.bf16 %v38_v5, %v37_v3  ;;  %v970_v9 = vld [vmem:[%s1433_s3] ss:$0 sm:$0xff]  ;;  %v129_v25 = vld [vmem:[%s1434_s4 + $0x8] sm:$0xff]  ;;  %v130_v29 = vld [vmem:[%s1434_s4 + $0x10] sm:$0xff]  ;;  %vm162_vm7 = vcmask 261120   ;;  %vm262_vm8 = vcmask 122880  }
   0x4   :  { %1104 = vmatpush3.bf16.msra.mxu0 %v1103_v4  ;;  %v128_v24 = vld [vmem:[%s1434_s4] sm:$0xff]  ;;  %v127_v28 = vld [vmem:[%s1435_s2 + $0x8] sm:$0xff]  ;;  %v131_v30 = vld [vmem:[%s1434_s4 + $0x18] sm:$0xff]  ;;  %s1208_s4 = smov 80   ;;  %vm964_vm9 = vcmask 3072  }
   0x5   :  { %1105 = vmatprep.subr.bf16.mxu0 %v1201_v0  ;;  %v126_v26 = vld [vmem:[%s1435_s2] sm:$0xff]  ;;  %v1301_v27 = vpack.c.bf16 %v129_v25, %v128_v24  ;;  %v1315_v32 = vpack.c.bf16 %v131_v30, %v130_v29  ;;  %s1207_s2 = smov 32  }
   0x6   :  { %v1312_v31 = vpack.c.bf16 %v127_v28, %v126_v26  ;;  %v1340_v38 = vld [vmem:[%s1436_s5] sm:$0x1] }
   0x7   :  { %1111 = vmatpush3.bf16.msra.mxu1 %v1301_v27 }
   0x8   :  { %1108 = vmatpush3.bf16.msk.msra.mxu0 %vm1107_vm3, %v1106_v7  ;;  %1112 = vmatprep.subr.bf16.mxu1 %v1201_v0 }
   0x9   :  { %1115 = vmatprep.subr.bf16.mxu0 %v1201_v0 }
   0xb   :  { %1028 = vmatmul.mubr.msk.f32.vlgmr.msra.gmra.mrb[0].mxu0 %vm46_vm4, %v34_v8  ;;  %1114 = vmatpush3.bf16.msra.mxu1 %v1315_v32 }
   0xc   :  { %1045 = vmatprep.mubr.msk.f32.mxu0 %vm1202_vm1, %v1203_v6  ;;  %1117 = vmatpush3.bf16.msra.mxu0 %v1312_v31 }
   0xd   :  { %1124 = vmatprep.subr.bf16.mxu0 %v1201_v0  ;;  %1118 = vmatprep.subr.bf16.mxu1 %v1201_v0 }
  0xde   :  { %v120_v10 = vpop.f32.mrb[0].mxu0 }
  0xdf   :  { %v121_v11 = vadd.f32 %v970_v9, %v120_v10  ;;  %v1029_v12 = vpop.f32.mrb[1].mxu0 }
  0xe1   :  { %125 = vst.msk [vmem:[#allocation2] sm:$0xf] %vm124_vm5, %v121_v11 }
  0xe8   :  { %v133_v13 = vld [vmem:[#allocation2] sm:$0x1]  ;;  %v264_v39 = vld [vmem:[#allocation2 + $0x1] sm:$0x1] }
  0xe9   :  { %1153 = vtanh.f32 %v133_v13  ;;  %v134_v15 = vmul.f32 0.5, %v133_v13  ;;  %v468_v13 = vld [vmem:[#allocation2 + $0x2] sm:$0x1] }
  0xeb   :  { %1155 = vtanh.f32 %v134_v15 }
  0xf3   :  { %v1154_v14 = vpop.eup %1153 }
  0xf4   :  { %141 = vrot.lane.b32.xlu0 %v1154_v14, %s1205_s0 }
  0xf5   :  { %v1156_v16 = vpop.eup %1155 }
  0xf6   :  { %v136_v17 = vadd.f32 1.0, %v1156_v16 }
  0xf8   :  { %v137_v18 = vmul.f32 0.5, %v136_v17 }
  0xfa   :  { %v139_v21 = vmul.f32 0.0, %v137_v18 }
 0x166   :  { %v142_v19 = vpop.permute.xlu0 %141 }
 0x167   :  { %v144_v20 = vmul.f32 %v142_v19, %v137_v18 }
 0x169   :  { %146 = vrot.lane.b32.xlu0 %v144_v20, %s1206_s20 }
 0x1db   :  { %v147_v22 = vpop.permute.xlu0 %146 }
 0x1dc   :  { %v1289_v23 = vadd.f32 %v147_v22, %v139_v21 }
 0x1de   :  { %1157 = vtanh.f32 %v1289_v23 }
 0x1e8   :  { %v1158_v33 = vpop.eup %1157 }
 0x1e9   :  { %152 = vrot.lane.b32.xlu1 %v1158_v33, %s1207_s2 }
 0x25b   :  { %v153_v34 = vpop.permute.xlu1 %152 }
 0x25c   :  { %v155_v35 = vmul.f32 %v153_v34, %v137_v18 }
 0x25e   :  { %157 = vrot.lane.b32.xlu1 %v155_v35, %s1208_s4 }
 0x2d0   :  { %v158_v36 = vpop.permute.xlu1 %157 }
 0x2d1   :  { %v161_v37 = vsel %vm160_vm6, %v158_v36, 0.0  ;;  %1046 = vmatmul.mubr.msk.f32.vlgmr.msra.gmra.mrb[2].mxu0 %vm160_vm6, %v158_v36 }
 0x2d2   :  { %1039 = vmatmul.mubr.msk.f32.vlgmr.msra.gmra.mrb[0].mxu1 %vm162_vm7, %v161_v37  ;;  %1126 = vmatpush3.bf16.msra.mxu0 %v1312_v31 }
 0x2d3   :  { %1120 = vmatpush3.bf16.msra.mxu1 %v1301_v27  ;;  %1063 = vmatprep.mubr.msk.f32.mxu0 %vm1202_vm1, %v1203_v6 }
 0x2d4   :  { %1121 = vmatprep.subr.bf16.mxu1 %v1201_v0  ;;  %1056 = vmatprep.mubr.msk.f32.mxu1 %vm1202_vm1, %v1203_v6 }
 0x2d5   :  { %1127 = vmatprep.subr.bf16.mxu0 %v1201_v0 }
 0x2d7   :  { %1123 = vmatpush3.bf16.msra.mxu1 %v1315_v32 }
 0x2d8   :  { %1133 = vmatprep.subr.bf16.mxu1 %v1201_v0 }
 0x3a4   :  { %v333_v40 = vpop.f32.mrb[2].mxu0 }
 0x3a5   :  { %v337_v41 = vadd.f32 %v333_v40, %v264_v39  ;;  %v232_v42 = vpop.f32.mrb[0].mxu1  ;;  %v1047_v43 = vpop.f32.mrb[3].mxu0 }
 0x3a6   :  { %v233_v44 = vadd.f32 %v232_v42, %v1340_v38  ;;  %v1040_v45 = vpop.f32.mrb[1].mxu1 }
 0x3a7   :  { %1159 = vtanh.f32 %v337_v41  ;;  %v338_v48 = vmul.f32 0.5, %v337_v41 }
 0x3a8   :  { %1161 = vtanh.f32 %v233_v44  ;;  %v236_v49 = vmul.f32 0.5, %v233_v44 }
 0x3a9   :  { %1163 = vtanh.f32 %v338_v48 }
 0x3aa   :  { %1165 = vtanh.f32 %v236_v49 }
 0x3b1   :  { %v1160_v46 = vpop.eup %1159 }
 0x3b2   :  { %v1162_v47 = vpop.eup %1161  ;;  %345 = vrot.lane.b32.xlu1 %v1160_v46, %s1205_s0 }
 0x3b3   :  { %243 = vrot.lane.b32.xlu0 %v1162_v47, %s1205_s0  ;;  %v1164_v50 = vpop.eup %1163 }
 0x3b4   :  { %v1166_v51 = vpop.eup %1165  ;;  %v340_v52 = vadd.f32 1.0, %v1164_v50 }
 0x3b5   :  { %v238_v53 = vadd.f32 1.0, %v1166_v51 }
 0x3b6   :  { %v341_v54 = vmul.f32 0.5, %v340_v52  ;;  %v672_v52 = vld [vmem:[#allocation2 + $0x3] sm:$0x1] }
 0x3b7   :  { %v239_v56 = vmul.f32 0.5, %v238_v53 }
 0x3b8   :  { %v343_v60 = vmul.f32 %v341_v54, %v1289_v23 }
 0x3b9   :  { %v241_v62 = vmul.f32 0.0, %v239_v56 }
 0x424   :  { %v346_v55 = vpop.permute.xlu1 %345 }
 0x425   :  { %v348_v57 = vmul.f32 %v346_v55, %v341_v54  ;;  %v244_v58 = vpop.permute.xlu0 %243 }
 0x426   :  { %v246_v59 = vmul.f32 %v244_v58, %v239_v56 }
 0x427   :  { %350 = vrot.lane.b32.xlu1 %v348_v57, %s1206_s20 }
 0x428   :  { %248 = vrot.lane.b32.xlu0 %v246_v59, %s1206_s20 }
 0x499   :  { %v351_v61 = vpop.permute.xlu1 %350 }
 0x49a   :  { %v353_v63 = vadd.f32 %v351_v61, %v343_v60  ;;  %v249_v1 = vpop.permute.xlu0 %248 }
 0x49b   :  { %v251_v2 = vadd.f32 %v249_v1, %v241_v62 }
 0x49c   :  { %1167 = vtanh.f32 %v353_v63 }
 0x49d   :  { %1169 = vtanh.f32 %v251_v2 }
 0x4a6   :  { %v1168_v3 = vpop.eup %1167 }
 0x4a7   :  { %v1170_v4 = vpop.eup %1169  ;;  %356 = vrot.lane.b32.xlu1 %v1168_v3, %s1207_s2 }
 0x4a8   :  { %254 = vrot.lane.b32.xlu0 %v1170_v4, %s1207_s2 }
 0x519   :  { %v357_v5 = vpop.permute.xlu1 %356 }
 0x51a   :  { %v359_v7 = vmul.f32 %v357_v5, %v341_v54  ;;  %v255_v8 = vpop.permute.xlu0 %254 }
 0x51b   :  { %v1350_v9 = vmul.f32 %v255_v8, %v239_v56 }
 0x51c   :  { %361 = vrot.lane.b32.xlu0 %v359_v7, %s1208_s4 }
 0x51d   :  { %364 = vrot.lane.b32.xlu1 %v1350_v9, %s1205_s0 }
 0x58e   :  { %v362_v10 = vpop.permute.xlu0 %361 }
 0x58f   :  { %1064 = vmatmul.mubr.msk.f32.vlgmr.msra.gmra.mrb[4].mxu0 %vm160_vm6, %v362_v10  ;;  %v365_v11 = vpop.permute.xlu1 %364 }
 0x590   :  { %v367_v12 = vsel %vm160_vm6, %v362_v10, %v365_v11  ;;  %1129 = vmatpush3.bf16.msra.mxu0 %v1301_v27  ;;  %1074 = vmatprep.mubr.msk.f32.mxu0 %vm1202_vm1, %v1203_v6 }
 0x591   :  { %1057 = vmatmul.mubr.msk.f32.vlgmr.msra.gmra.mrb[2].mxu1 %vm162_vm7, %v367_v12  ;;  %1130 = vmatprep.subr.bf16.mxu0 %v1201_v0 }
 0x592   :  { %1135 = vmatpush3.bf16.msra.mxu1 %v1312_v31  ;;  %1081 = vmatprep.mubr.msk.f32.mxu1 %vm1202_vm1, %v1203_v6 }
 0x593   :  { %1136 = vmatprep.subr.bf16.mxu1 %v1201_v0 }
 0x594   :  { %1132 = vmatpush3.bf16.msra.mxu0 %v1315_v32 }
 0x595   :  { %1142 = vmatprep.subr.bf16.mxu0 %v1201_v0 }
 0x662   :  { %v537_v14 = vpop.f32.mrb[4].mxu0 }
 0x663   :  { %v541_v15 = vadd.f32 %v537_v14, %v468_v13  ;;  %v1065_v16 = vpop.f32.mrb[5].mxu0 }
 0x664   :  { %v437_v17 = vpop.f32.mrb[2].mxu1 }
 0x665   :  { %1171 = vtanh.f32 %v541_v15  ;;  %v438_v18 = vadd.f32 %v437_v17, %v1340_v38  ;;  %v1058_v19 = vpop.f32.mrb[3].mxu1  ;;  %v542_v22 = vmul.f32 0.5, %v541_v15 }
 0x667   :  { %1173 = vtanh.f32 %v438_v18  ;;  %v441_v23 = vmul.f32 0.5, %v438_v18 }
 0x668   :  { %1175 = vtanh.f32 %v542_v22 }
 0x669   :  { %1177 = vtanh.f32 %v441_v23 }
 0x66f   :  { %v1172_v20 = vpop.eup %1171 }
 0x670   :  { %549 = vrot.lane.b32.xlu1 %v1172_v20, %s1205_s0 }
 0x671   :  { %v1174_v21 = vpop.eup %1173 }
 0x672   :  { %448 = vrot.lane.b32.xlu0 %v1174_v21, %s1205_s0  ;;  %v1176_v24 = vpop.eup %1175 }
 0x673   :  { %v1178_v25 = vpop.eup %1177  ;;  %v544_v26 = vadd.f32 1.0, %v1176_v24 }
 0x674   :  { %v443_v28 = vadd.f32 1.0, %v1178_v25 }
 0x675   :  { %v545_v29 = vmul.f32 0.5, %v544_v26 }
 0x676   :  { %v444_v33 = vmul.f32 0.5, %v443_v28 }
 0x677   :  { %v547_v36 = vmul.f32 %v545_v29, %v353_v63 }
 0x678   :  { %v446_v40 = vmul.f32 %v444_v33, %v251_v2 }
 0x6e2   :  { %v550_v30 = vpop.permute.xlu1 %549 }
 0x6e3   :  { %v552_v31 = vmul.f32 %v550_v30, %v545_v29 }
 0x6e4   :  { %v449_v34 = vpop.permute.xlu0 %448 }
 0x6e5   :  { %554 = vrot.lane.b32.xlu1 %v552_v31, %s1206_s20  ;;  %v451_v35 = vmul.f32 %v449_v34, %v444_v33 }
 0x6e7   :  { %453 = vrot.lane.b32.xlu0 %v451_v35, %s1206_s20 }
 0x757   :  { %v555_v37 = vpop.permute.xlu1 %554 }
 0x758   :  { %v557_v39 = vadd.f32 %v555_v37, %v547_v36 }
 0x759   :  { %v454_v41 = vpop.permute.xlu0 %453 }
 0x75a   :  { %1179 = vtanh.f32 %v557_v39  ;;  %v456_v42 = vadd.f32 %v454_v41, %v446_v40  ;;  %v878_v41 = vld [vmem:[%s1437_s6 + $0x8] sm:$0xff] }
 0x75c   :  { %1181 = vtanh.f32 %v456_v42 }
 0x764   :  { %v1180_v43 = vpop.eup %1179 }
 0x765   :  { %560 = vrot.lane.b32.xlu1 %v1180_v43, %s1207_s2  ;;  %v14_v43 = vstv %s1438_s7 }
 0x766   :  { %v1182_v44 = vpop.eup %1181  ;;  %15 = vst [vmem:[#allocation4] sm:$0x1] %v14_v43 }
 0x767   :  { %459 = vrot.lane.b32.xlu0 %v1182_v44, %s1207_s2 }
 0x7d7   :  { %v561_v45 = vpop.permute.xlu1 %560 }
 0x7d8   :  { %v563_v46 = vmul.f32 %v561_v45, %v545_v29 }
 0x7d9   :  { %v460_v47 = vpop.permute.xlu0 %459 }
 0x7da   :  { %565 = vrot.lane.b32.xlu0 %v563_v46, %s1208_s4  ;;  %v1376_v48 = vmul.f32 %v460_v47, %v444_v33 }
 0x7dc   :  { %568 = vrot.lane.b32.xlu1 %v1376_v48, %s1205_s0 }
 0x84c   :  { %v566_v49 = vpop.permute.xlu0 %565 }
 0x84d   :  { %1082 = vmatmul.mubr.msk.f32.vlgmr.msra.gmra.mrb[4].mxu1 %vm160_vm6, %v566_v49 }
 0x84e   :  { %1138 = vmatpush3.bf16.msra.mxu1 %v1301_v27  ;;  %1092 = vmatprep.mubr.msk.f32.mxu1 %vm1202_vm1, %v1203_v6  ;;  %v569_v50 = vpop.permute.xlu1 %568 }
 0x84f   :  { %1139 = vmatprep.subr.bf16.mxu1 %v1201_v0  ;;  %v571_v51 = vsel %vm160_vm6, %v566_v49, %v569_v50  ;;  %v959_v49 = vld [vmem:[%s1439_s8] sm:$0xf] }
 0x850   :  { %1075 = vmatmul.mubr.msk.f32.vlgmr.msra.gmra.mrb[6].mxu0 %vm162_vm7, %v571_v51  ;;  %v960_v50 = vmul.f32 1e-08, %v959_v49 }
 0x851   :  { %1099 = vmatprep.mubr.msk.f32.mxu0 %vm1202_vm1, %v1203_v6 }
 0x852   :  { %1141 = vmatpush3.bf16.msra.mxu1 %v1315_v32  ;;  %v961_v51 = vadd.f32 1.0, %v960_v50 }
 0x920   :  { %v741_v53 = vpop.f32.mrb[4].mxu1 }
 0x921   :  { %v745_v54 = vadd.f32 %v741_v53, %v672_v52  ;;  %v1083_v55 = vpop.f32.mrb[5].mxu1  ;;  %v980_v52 = vld [vmem:[#allocation4] ss:$0 sm:$0xff]  ;;  %v962_v53 = vmax.f32 %v961_v51, 0.0 }
 0x923   :  { %1183 = vtanh.f32 %v745_v54  ;;  %v641_v27 = vpop.f32.mrb[6].mxu0  ;;  %v746_v32 = vmul.f32 0.5, %v745_v54 }
 0x924   :  { %v642_v56 = vadd.f32 %v641_v27, %v1340_v38  ;;  %v1076_v57 = vpop.f32.mrb[7].mxu0 }
 0x926   :  { %1185 = vtanh.f32 %v642_v56  ;;  %v645_v59 = vmul.f32 0.5, %v642_v56 }
 0x927   :  { %1187 = vtanh.f32 %v746_v32 }
 0x928   :  { %1189 = vtanh.f32 %v645_v59 }
 0x92d   :  { %v1184_v0 = vpop.eup %1183 }
 0x92e   :  { %753 = vrot.lane.b32.xlu1 %v1184_v0, %s1205_s0 }
 0x930   :  { %v1186_v58 = vpop.eup %1185 }
 0x931   :  { %652 = vrot.lane.b32.xlu0 %v1186_v58, %s1205_s0  ;;  %v1188_v6 = vpop.eup %1187 }
 0x932   :  { %v748_v60 = vadd.f32 1.0, %v1188_v6  ;;  %v1190_v61 = vpop.eup %1189 }
 0x933   :  { %v647_v63 = vadd.f32 1.0, %v1190_v61 }
 0x934   :  { %v749_v62 = vmul.f32 0.5, %v748_v60 }
 0x935   :  { %v648_v3 = vmul.f32 0.5, %v647_v63 }
 0x936   :  { %v751_v7 = vmul.f32 %v749_v62, %v557_v39 }
 0x937   :  { %v650_v11 = vmul.f32 %v648_v3, %v456_v42 }
 0x9a0   :  { %v754_v1 = vpop.permute.xlu1 %753 }
 0x9a1   :  { %v756_v2 = vmul.f32 %v754_v1, %v749_v62 }
 0x9a3   :  { %758 = vrot.lane.b32.xlu1 %v756_v2, %s1206_s20  ;;  %v653_v4 = vpop.permute.xlu0 %652 }
 0x9a4   :  { %v655_v5 = vmul.f32 %v653_v4, %v648_v3 }
 0x9a6   :  { %657 = vrot.lane.b32.xlu0 %v655_v5, %s1206_s20 }
 0xa15   :  { %v759_v8 = vpop.permute.xlu1 %758 }
 0xa16   :  { %v761_v10 = vadd.f32 %v759_v8, %v751_v7 }
 0xa18   :  { %1191 = vtanh.f32 %v761_v10  ;;  %v658_v12 = vpop.permute.xlu0 %657 }
 0xa19   :  { %v660_v13 = vadd.f32 %v658_v12, %v650_v11 }
 0xa1b   :  { %1193 = vtanh.f32 %v660_v13 }
 0xa22   :  { %v1192_v14 = vpop.eup %1191 }
 0xa23   :  { %764 = vrot.lane.b32.xlu1 %v1192_v14, %s1207_s2 }
 0xa25   :  { %v1194_v15 = vpop.eup %1193 }
 0xa26   :  { %663 = vrot.lane.b32.xlu0 %v1194_v15, %s1207_s2 }
 0xa95   :  { %v765_v16 = vpop.permute.xlu1 %764 }
 0xa96   :  { %v767_v17 = vmul.f32 %v765_v16, %v749_v62 }
 0xa98   :  { %769 = vrot.lane.b32.xlu0 %v767_v17, %s1208_s4  ;;  %v664_v18 = vpop.permute.xlu0 %663 }
 0xa99   :  { %v666_v19 = vmul.f32 %v664_v18, %v648_v3 }
 0xa9b   :  { %772 = vrot.lane.b32.xlu1 %v666_v19, %s1205_s0 }
 0xb0a   :  { %v770_v20 = vpop.permute.xlu0 %769 }
 0xb0d   :  { %v773_v21 = vpop.permute.xlu1 %772 }
 0xb0e   :  { %v775_v22 = vsel %vm160_vm6, %v770_v20, %v773_v21 }
 0xb0f   :  { %1093 = vmatmul.mubr.msk.f32.vlgmr.msra.gmra.mrb[6].mxu1 %vm162_vm7, %v775_v22 }
 0xbe2   :  { %v845_v23 = vpop.f32.mrb[6].mxu1 }
 0xbe3   :  { %v846_v24 = vadd.f32 %v845_v23, %v1340_v38  ;;  %v1094_v25 = vpop.f32.mrb[7].mxu1 }
 0xbe5   :  { %1195 = vtanh.f32 %v846_v24  ;;  %v849_v28 = vmul.f32 0.5, %v846_v24 }
 0xbe7   :  { %1197 = vtanh.f32 %v849_v28 }
 0xbef   :  { %v1196_v26 = vpop.eup %1195 }
 0xbf0   :  { %856 = vrot.lane.b32.xlu0 %v1196_v26, %s1205_s0 }
 0xbf1   :  { %v1198_v29 = vpop.eup %1197 }
 0xbf2   :  { %v851_v30 = vadd.f32 1.0, %v1198_v29 }
 0xbf4   :  { %v852_v31 = vmul.f32 0.5, %v851_v30 }
 0xbf6   :  { %v854_v38 = vmul.f32 %v852_v31, %v660_v13 }
 0xc62   :  { %v857_v33 = vpop.permute.xlu0 %856 }
 0xc63   :  { %v859_v34 = vmul.f32 %v857_v33, %v852_v31 }
 0xc65   :  { %861 = vrot.lane.b32.xlu1 %v859_v34, %s1206_s20 }
 0xc69   :  { %259 = vrot.lane.b32.xlu1 %v1350_v9, %s1208_s4  ;;  %v877_v9 = vld [vmem:[%s1437_s6] sm:$0xff] }
 0xc6a   :  { %v1143_v42 = vpack.c.bf16 %v878_v41, %v877_v9 }
 0xc6c   :  { %1144 = vmatpush3.bf16.msra.mxu0 %v1143_v42 }
 0xc6d   :  { %668 = vrot.lane.b32.xlu1 %v666_v19, %s1208_s4 }
 0xcd7   :  { %v862_v35 = vpop.permute.xlu1 %861 }
 0xcd8   :  { %v864_v36 = vadd.f32 %v862_v35, %v854_v38 }
 0xcda   :  { %1199 = vtanh.f32 %v864_v36 }
 0xcdb   :  { %v260_v37 = vpop.permute.xlu1 %259 }
 0xcdc   :  { %263 = vst.msk [vmem:[#allocation3] sm:$0x1] %vm262_vm8, %v260_v37 }
 0xcdf   :  { %v669_v39 = vpop.permute.xlu1 %668 }
 0xce0   :  { %671 = vst.msk [vmem:[#allocation3 + $0x2] sm:$0x1] %vm262_vm8, %v669_v39 }
 0xce4   :  { %v1200_v40 = vpop.eup %1199 }
 0xce5   :  { %867 = vrot.lane.b32.xlu0 %v1200_v40, %s1207_s2 }
 0xce9   :  { %464 = vrot.lane.b32.xlu0 %v1376_v48, %s1208_s4 }
 0xd57   :  { %v868_v44 = vpop.permute.xlu0 %867 }
 0xd58   :  { %v870_v45 = vmul.f32 %v868_v44, %v852_v31 }
 0xd5a   :  { %872 = vrot.lane.b32.xlu0 %v870_v45, %s1208_s4 }
 0xd5b   :  { %v465_v46 = vpop.permute.xlu0 %464 }
 0xd5c   :  { %467 = vst.msk [vmem:[#allocation3 + $0x1] sm:$0x1] %vm262_vm8, %v465_v46 }
 0xdcc   :  { %v873_v47 = vpop.permute.xlu0 %872 }
 0xdcd   :  { %875 = vst.msk [vmem:[#allocation3 + $0x3] sm:$0x1] %vm262_vm8, %v873_v47 }
 0xdd4   :  { %v876_v48 = vld [vmem:[#allocation3] sm:$0xf] }
 0xdd5   :  { %1100 = vmatmul.mubr.msk.f32.vlgmr.msra.gmra.mrb[8].mxu0 %vm160_vm6, %v876_v48 }
 0xea8   :  { %v955_v54 = vpop.f32.mrb[8].mxu0 }
 0xea9   :  { %v956_v55 = vadd.f32 %v980_v52, %v955_v54  ;;  %v1101_v27 = vpop.f32.mrb[9].mxu0 }
 0xeab   :  { %v963_v56 = vmul.f32 %v962_v53, %v956_v55 }
 0xead   :  { %965 = vst.msk [vmem:[%s1440_s9] sm:$0xf] %vm964_vm9, %v963_v56 }

</bundles_post_ra>
